<compile_context>
chip_gen: v5e
topology: v5e:2x2
jax: 0.10.0
libtpu: 0.0.40
codegen_flags: <defaults>
</compile_context>

<pallas_src>
import jax
import jax.numpy as jnp
from jax.experimental import pallas as pl
from jax.experimental.pallas import tpu as pltpu

# ---- model hyper-parameters (small, consistent with the module) -------------
N_CLASS = 32     # vocabulary size
EMB_SIZE = 16    # embedding dim
N_HIDDEN = 32    # LSTM hidden dim -> 4H = 128 (one full vreg lane width)
SEQ_LEN = 8
BATCH = 8

F, I, C, O = 0, 1, 2, 3  # gate order inside the stacked / fused weight tensors


# -----------------------------------------------------------------------------
# Pallas kernel
# -----------------------------------------------------------------------------
def lstm_kernel(ids_ref, xtab_ref, v1_ref, u2_ref, v2_ref, b1_ref,
                wout_ref, bout_ref, out_ref):
    """Two stacked LSTM layers, fully unrolled over time, then projection.

    ids_ref : (T*B, 1) int32   time-major token ids (row r = t*B + b)
    xtab_ref: (N_CLASS, 4H)    precomputed  C @ U1f + b1f  (c-cols pre-scaled x2)
    v1_ref  : (H, 4H)          layer-1 recurrent weights  (c-cols x2)
    u2_ref  : (H, 4H)          layer-2 input   weights    (c-cols x2)
    v2_ref  : (H, 4H)          layer-2 recurrent weights  (c-cols x2)
    b1_ref  : (1, 4H)          layer-1 biases, reused by layer 2 (c-part x2)
    wout_ref: (H, C)           output projection
    bout_ref: (1, C)           output bias
    out_ref : (B, C)
    """
    TB = ids_ref.shape[0]
    NC = xtab_ref.shape[0]
    H4 = v1_ref.shape[1]
    H = H4 // 4
    B = out_ref.shape[0]
    T = TB // B

    # --- one-shot: embedding + layer-1 input path for ALL timesteps ----------
    # one-hot (T*B, NC) via lane-iota compare, then a single (64,32)@(32,128)
    # MXU matmul.  Depends only on the token ids -> entirely off the recurrence
    # critical path.
    ids = ids_ref[...]                                            # (T*B, 1)
    classes = jax.lax.broadcasted_iota(jnp.int32, (TB, NC), 1)    # (T*B, NC)
    onehot = (classes == ids).astype(jnp.float32)
    xg_all = jnp.dot(onehot, xtab_ref[...],
                     preferred_element_type=jnp.float32)          # (T*B, 4H)

    # --- hoist every weight/bias load + the bias broadcast out of the loop ---
    v1 = v1_ref[...]                                              # (H, 4H)
    u2 = u2_ref[...]                                              # (H, 4H)
    v2 = v2_ref[...]                                              # (H, 4H)
    b1 = jnp.broadcast_to(b1_ref[...], (B, H4))                   # (B, 4H)

    def split_gates(g):
        # One 128-lane sigmoid over the whole gates vreg; candidate gate via
        # tanh(x) = 2*sigmoid(2x) - 1 (the x2 is baked into the weights/bias).
        s = jax.nn.sigmoid(g)
        f = s[:, 0 * H:1 * H]
        i = s[:, 1 * H:2 * H]
        c = 2.0 * s[:, 2 * H:3 * H] - 1.0
        o = s[:, 3 * H:4 * H]
        return f, i, c, o

    h1 = c1 = h2 = c2 = jnp.zeros((B, H), jnp.float32)

    # T is a small compile-time constant: fully unroll (resident state fits in
    # ~30 vregs, no spill pressure) so adjacent-step work can be interleaved.
    for t in range(T):
        xg = xg_all[t * B:(t + 1) * B, :]                         # (B, 4H)

        # ---- layer 1: x-path precomputed; only the recurrent dot remains ----
        g1pre = xg + jnp.dot(h1, v1, preferred_element_type=jnp.float32)
        f1, i1, g1, o1 = split_gates(g1pre)
        c1 = c1 * f1 + i1 * g1
        h1 = o1 * jnp.tanh(c1)

        # ---- layer 2: no lane concat — two dots summed on the VPU -----------
        # (reuses the layer-1 biases, replicating the reference module)
        g2pre = (jnp.dot(h1, u2, preferred_element_type=jnp.float32)
                 + jnp.dot(h2, v2, preferred_element_type=jnp.float32) + b1)
        f2, i2, g2, o2 = split_gates(g2pre)
        c2 = c2 * f2 + i2 * g2
        h2 = o2 * jnp.tanh(c2)

    # Final projection (fires once per call; masked 32-lane store is fine).
    out_ref[...] = (jnp.dot(h2, wout_ref[...], preferred_element_type=jnp.float32)
                    + bout_ref[...])


# -----------------------------------------------------------------------------
# Wrapper / parameter plumbing
# -----------------------------------------------------------------------------
def _fuse_scaled(w):
    """(4, in, H) stacked [f,i,c,o] -> (in, 4H); candidate ('c') columns x2."""
    H = w.shape[-1]
    fused = jnp.concatenate([w[F], w[I], w[C], w[O]], axis=1)
    return fused.at[:, 2 * H:3 * H].multiply(2.0)


def fuse_params(params):
    """One-time fusion: lane-dense matmul operands + precomputed x-path table."""
    H = N_HIDDEN
    b1 = params["b1"]                                      # (4, H)
    b1f = jnp.concatenate([b1[F], b1[I], 2.0 * b1[C], b1[O]])[None, :]  # (1,4H)
    u1f = _fuse_scaled(params["U1"])                       # (E, 4H)
    # layer-1 input path + bias, folded over the whole vocabulary once:
    xtab = params["C"] @ u1f + b1f                         # (N_CLASS, 4H)
    return {
        "xtab": xtab,
        "V1f": _fuse_scaled(params["V1"]),                 # (H, 4H)
        "U2f": _fuse_scaled(params["U2"]),                 # (H, 4H)
        "V2f": _fuse_scaled(params["V2"]),                 # (H, 4H)
        "b1f": b1f,                                        # (1, 4H)
        "W": params["W"],                                  # (H, C)
        "b": params["b"],                                  # (1, C)
    }


def text_lstm_forward(token_ids, fused):
    """token_ids: (B, T) int32 -> logits (B, N_CLASS) float32."""
    B, T = token_ids.shape
    # Only a 256-byte int32 transpose/reshape stays outside the kernel; the
    # embedding rows themselves never leave the chip-side table matmul.
    ids_col = jnp.transpose(token_ids).reshape(T * B, 1)   # time-major (T*B, 1)

    vmem = pl.BlockSpec(memory_space=pltpu.MemorySpace.VMEM)
    return pl.pallas_call(
        lstm_kernel,
        out_shape=jax.ShapeDtypeStruct((B, N_CLASS), jnp.float32),
        in_specs=[vmem] * 8,
        out_specs=vmem,
    )(ids_col, fused["xtab"], fused["V1f"], fused["U2f"], fused["V2f"],
      fused["b1f"], fused["W"], fused["b"])


def init_params(key):
    """Deterministic synthetic parameters matching the module's shapes."""
    ks = jax.random.split(key, 7)
    scale_e = 1.0 / jnp.sqrt(EMB_SIZE)
    scale_h = 1.0 / jnp.sqrt(N_HIDDEN)
    params = {
        "C": jax.random.normal(ks[0], (N_CLASS, EMB_SIZE), jnp.float32),
        # stacked (4, in, out) in gate order [f, i, c, o]
        "U1": jax.random.uniform(ks[1], (4, EMB_SIZE, N_HIDDEN), jnp.float32,
                                 -scale_e, scale_e),
        "V1": jax.random.uniform(ks[2], (4, N_HIDDEN, N_HIDDEN), jnp.float32,
                                 -scale_h, scale_h),
        "b1": jnp.ones((4, N_HIDDEN), jnp.float32),   # b_f1,b_i1,b_c1,b_o1 = ones
        "U2": jax.random.uniform(ks[3], (4, N_HIDDEN, N_HIDDEN), jnp.float32,
                                 -scale_h, scale_h),
        "V2": jax.random.uniform(ks[4], (4, N_HIDDEN, N_HIDDEN), jnp.float32,
                                 -scale_h, scale_h),
        # b_*2 parameters exist in __init__ but are never used in forward (bug
        # in the reference module), so they are intentionally omitted here.
        "W": jax.random.uniform(ks[5], (N_HIDDEN, N_CLASS), jnp.float32,
                                -scale_h, scale_h),
        "b": jnp.ones((1, N_CLASS), jnp.float32),
    }
    return params


def reference_forward(token_ids, params):
    """Pure-JAX reference of the PyTorch forward (unfused), for validation."""
    emb = params["C"][token_ids]
    x_seq = jnp.transpose(emb, (1, 0, 2))
    B = token_ids.shape[0]
    h1 = c1 = h2 = c2 = jnp.zeros((B, N_HIDDEN), jnp.float32)
    U1, V1, b1 = params["U1"], params["V1"], params["b1"]
    U2, V2 = params["U2"], params["V2"]
    for t in range(x_seq.shape[0]):
        x = x_seq[t]
        f1 = jax.nn.sigmoid(x @ U1[F] + h1 @ V1[F] + b1[F])
        i1 = jax.nn.sigmoid(x @ U1[I] + h1 @ V1[I] + b1[I])
        g1 = jnp.tanh(x @ U1[C] + h1 @ V1[C] + b1[C])
        c1 = c1 * f1 + i1 * g1
        o1 = jax.nn.sigmoid(x @ U1[O] + h1 @ V1[O] + b1[O])
        h1 = o1 * jnp.tanh(c1)
        # layer 2 reuses the layer-1 biases, exactly like the PyTorch module
        f2 = jax.nn.sigmoid(h1 @ U2[F] + h2 @ V2[F] + b1[F])
        i2 = jax.nn.sigmoid(h1 @ U2[I] + h2 @ V2[I] + b1[I])
        g2 = jnp.tanh(h1 @ U2[C] + h2 @ V2[C] + b1[C])
        c2 = c2 * f2 + i2 * g2
        o2 = jax.nn.sigmoid(h1 @ U2[O] + h2 @ V2[O] + b1[O])
        h2 = o2 * jnp.tanh(c2)
    return h2 @ params["W"] + params["b"]


if __name__ == "__main__":
    key = jax.random.PRNGKey(0)
    k_param, k_data = jax.random.split(key)
    params = init_params(k_param)
    fused = fuse_params(params)
    token_ids = jax.random.randint(k_data, (BATCH, SEQ_LEN), 0, N_CLASS,
                                   dtype=jnp.int32)

    out = jax.block_until_ready(text_lstm_forward(token_ids, fused))
    ref = jax.block_until_ready(reference_forward(token_ids, params))

    assert out.shape == (BATCH, N_CLASS), out.shape
    assert jnp.allclose(out, ref, atol=2e-4, rtol=2e-4), (
        f"max abs err {jnp.max(jnp.abs(out - ref))}")
    print("KERNEL_OK")
</pallas_src>

<mosaic_0001>
module attributes {stable_mosaic.version = 11 : i64} {
  func.func @lstm_kernel(%arg0: memref<64x1xi32, #tpu.memory_space<vmem>>, %arg1: memref<32x128xf32, #tpu.memory_space<vmem>>, %arg2: memref<32x128xf32, #tpu.memory_space<vmem>>, %arg3: memref<32x128xf32, #tpu.memory_space<vmem>>, %arg4: memref<32x128xf32, #tpu.memory_space<vmem>>, %arg5: memref<1x128xf32, #tpu.memory_space<vmem>>, %arg6: memref<32x32xf32, #tpu.memory_space<vmem>>, %arg7: memref<1x32xf32, #tpu.memory_space<vmem>>, %arg8: memref<8x32xf32, #tpu.memory_space<vmem>>) attributes {dimension_semantics = [], scalar_prefetch = 0 : i64, scratch_operands = 0 : i64, tpu.core_type = #tpu.core_type<tc>} {
    %c0 = arith.constant 0 : index
    %c0_0 = arith.constant 0 : index
    %0 = vector.load %arg0[%c0, %c0_0] : memref<64x1xi32, #tpu.memory_space<vmem>>, vector<64x1xi32>
    %1 = tpu.iota {dimensions = array<i32: 1>} : vector<64x32xi32>
    %2 = vector.broadcast %0 : vector<64x1xi32> to vector<64x32xi32>
    %3 = arith.cmpi eq, %1, %2 : vector<64x32xi32>
    %4 = arith.extui %3 : vector<64x32xi1> to vector<64x32xi32>
    %5 = arith.sitofp %4 : vector<64x32xi32> to vector<64x32xf32>
    %c0_1 = arith.constant 0 : index
    %c0_2 = arith.constant 0 : index
    %6 = vector.load %arg1[%c0_1, %c0_2] : memref<32x128xf32, #tpu.memory_space<vmem>>, vector<32x128xf32>
    %cst = arith.constant dense<0.000000e+00> : vector<64x128xf32>
    %7 = tpu.matmul %5, %6, %cst {dimension_numbers = #tpu.dot_dimension_numbers<[1], [0], [0], [1], [0, 0, 1, 1], [], []>} : vector<64x32xf32>, vector<32x128xf32>, vector<64x128xf32> -> vector<64x128xf32>
    %c0_3 = arith.constant 0 : index
    %c0_4 = arith.constant 0 : index
    %8 = vector.load %arg2[%c0_3, %c0_4] : memref<32x128xf32, #tpu.memory_space<vmem>>, vector<32x128xf32>
    %c0_5 = arith.constant 0 : index
    %c0_6 = arith.constant 0 : index
    %9 = vector.load %arg3[%c0_5, %c0_6] : memref<32x128xf32, #tpu.memory_space<vmem>>, vector<32x128xf32>
    %c0_7 = arith.constant 0 : index
    %c0_8 = arith.constant 0 : index
    %10 = vector.load %arg4[%c0_7, %c0_8] : memref<32x128xf32, #tpu.memory_space<vmem>>, vector<32x128xf32>
    %c0_9 = arith.constant 0 : index
    %c0_10 = arith.constant 0 : index
    %11 = vector.load %arg5[%c0_9, %c0_10] : memref<1x128xf32, #tpu.memory_space<vmem>>, vector<1x128xf32>
    %12 = vector.shape_cast %11 : vector<1x128xf32> to vector<1x128xf32>
    %13 = vector.broadcast %12 : vector<1x128xf32> to vector<8x128xf32>
    %cst_11 = arith.constant 0.000000e+00 : f32
    %14 = vector.broadcast %cst_11 : f32 to vector<8x32xf32>
    %15 = vector.extract_strided_slice %7 {offsets = [0, 0], sizes = [8, 128], strides = [1, 1]} : vector<64x128xf32> to vector<8x128xf32>
    %cst_12 = arith.constant dense<0.000000e+00> : vector<8x128xf32>
    %16 = tpu.matmul %14, %8, %cst_12 {dimension_numbers = #tpu.dot_dimension_numbers<[1], [0], [0], [1], [0, 0, 1, 1], [], []>} : vector<8x32xf32>, vector<32x128xf32>, vector<8x128xf32> -> vector<8x128xf32>
    %17 = arith.addf %15, %16 : vector<8x128xf32>
    %18 = arith.negf %17 : vector<8x128xf32>
    %19 = math.exp %18 : vector<8x128xf32>
    %cst_13 = arith.constant 1.000000e+00 : f32
    %20 = vector.broadcast %cst_13 : f32 to vector<8x128xf32>
    %21 = arith.addf %20, %19 : vector<8x128xf32>
    %22 = arith.divf %20, %21 : vector<8x128xf32>
    %23 = vector.extract_strided_slice %22 {offsets = [0, 0], sizes = [8, 32], strides = [1, 1]} : vector<8x128xf32> to vector<8x32xf32>
    %24 = vector.extract_strided_slice %22 {offsets = [0, 32], sizes = [8, 32], strides = [1, 1]} : vector<8x128xf32> to vector<8x32xf32>
    %25 = vector.extract_strided_slice %22 {offsets = [0, 64], sizes = [8, 32], strides = [1, 1]} : vector<8x128xf32> to vector<8x32xf32>
    %cst_14 = arith.constant 2.000000e+00 : f32
    %26 = vector.broadcast %cst_14 : f32 to vector<8x32xf32>
    %27 = arith.mulf %26, %25 : vector<8x32xf32>
    %cst_15 = arith.constant 1.000000e+00 : f32
    %28 = vector.broadcast %cst_15 : f32 to vector<8x32xf32>
    %29 = arith.subf %27, %28 : vector<8x32xf32>
    %30 = vector.extract_strided_slice %22 {offsets = [0, 96], sizes = [8, 32], strides = [1, 1]} : vector<8x128xf32> to vector<8x32xf32>
    %31 = arith.mulf %14, %23 : vector<8x32xf32>
    %32 = arith.mulf %24, %29 : vector<8x32xf32>
    %33 = arith.addf %31, %32 : vector<8x32xf32>
    %34 = math.tanh %33 : vector<8x32xf32>
    %35 = arith.mulf %30, %34 : vector<8x32xf32>
    %cst_16 = arith.constant dense<0.000000e+00> : vector<8x128xf32>
    %36 = tpu.matmul %35, %9, %cst_16 {dimension_numbers = #tpu.dot_dimension_numbers<[1], [0], [0], [1], [0, 0, 1, 1], [], []>} : vector<8x32xf32>, vector<32x128xf32>, vector<8x128xf32> -> vector<8x128xf32>
    %cst_17 = arith.constant dense<0.000000e+00> : vector<8x128xf32>
    %37 = tpu.matmul %14, %10, %cst_17 {dimension_numbers = #tpu.dot_dimension_numbers<[1], [0], [0], [1], [0, 0, 1, 1], [], []>} : vector<8x32xf32>, vector<32x128xf32>, vector<8x128xf32> -> vector<8x128xf32>
    %38 = arith.addf %36, %37 : vector<8x128xf32>
    %39 = arith.addf %38, %13 : vector<8x128xf32>
    %40 = arith.negf %39 : vector<8x128xf32>
    %41 = math.exp %40 : vector<8x128xf32>
    %cst_18 = arith.constant 1.000000e+00 : f32
    %42 = vector.broadcast %cst_18 : f32 to vector<8x128xf32>
    %43 = arith.addf %42, %41 : vector<8x128xf32>
    %44 = arith.divf %42, %43 : vector<8x128xf32>
    %45 = vector.extract_strided_slice %44 {offsets = [0, 0], sizes = [8, 32], strides = [1, 1]} : vector<8x128xf32> to vector<8x32xf32>
    %46 = vector.extract_strided_slice %44 {offsets = [0, 32], sizes = [8, 32], strides = [1, 1]} : vector<8x128xf32> to vector<8x32xf32>
    %47 = vector.extract_strided_slice %44 {offsets = [0, 64], sizes = [8, 32], strides = [1, 1]} : vector<8x128xf32> to vector<8x32xf32>
    %cst_19 = arith.constant 2.000000e+00 : f32
    %48 = vector.broadcast %cst_19 : f32 to vector<8x32xf32>
    %49 = arith.mulf %48, %47 : vector<8x32xf32>
    %cst_20 = arith.constant 1.000000e+00 : f32
    %50 = vector.broadcast %cst_20 : f32 to vector<8x32xf32>
    %51 = arith.subf %49, %50 : vector<8x32xf32>
    %52 = vector.extract_strided_slice %44 {offsets = [0, 96], sizes = [8, 32], strides = [1, 1]} : vector<8x128xf32> to vector<8x32xf32>
    %53 = arith.mulf %14, %45 : vector<8x32xf32>
    %54 = arith.mulf %46, %51 : vector<8x32xf32>
    %55 = arith.addf %53, %54 : vector<8x32xf32>
    %56 = math.tanh %55 : vector<8x32xf32>
    %57 = arith.mulf %52, %56 : vector<8x32xf32>
    %58 = vector.extract_strided_slice %7 {offsets = [8, 0], sizes = [8, 128], strides = [1, 1]} : vector<64x128xf32> to vector<8x128xf32>
    %cst_21 = arith.constant dense<0.000000e+00> : vector<8x128xf32>
    %59 = tpu.matmul %35, %8, %cst_21 {dimension_numbers = #tpu.dot_dimension_numbers<[1], [0], [0], [1], [0, 0, 1, 1], [], []>} : vector<8x32xf32>, vector<32x128xf32>, vector<8x128xf32> -> vector<8x128xf32>
    %60 = arith.addf %58, %59 : vector<8x128xf32>
    %61 = arith.negf %60 : vector<8x128xf32>
    %62 = math.exp %61 : vector<8x128xf32>
    %cst_22 = arith.constant 1.000000e+00 : f32
    %63 = vector.broadcast %cst_22 : f32 to vector<8x128xf32>
    %64 = arith.addf %63, %62 : vector<8x128xf32>
    %65 = arith.divf %63, %64 : vector<8x128xf32>
    %66 = vector.extract_strided_slice %65 {offsets = [0, 0], sizes = [8, 32], strides = [1, 1]} : vector<8x128xf32> to vector<8x32xf32>
    %67 = vector.extract_strided_slice %65 {offsets = [0, 32], sizes = [8, 32], strides = [1, 1]} : vector<8x128xf32> to vector<8x32xf32>
    %68 = vector.extract_strided_slice %65 {offsets = [0, 64], sizes = [8, 32], strides = [1, 1]} : vector<8x128xf32> to vector<8x32xf32>
    %cst_23 = arith.constant 2.000000e+00 : f32
    %69 = vector.broadcast %cst_23 : f32 to vector<8x32xf32>
    %70 = arith.mulf %69, %68 : vector<8x32xf32>
    %cst_24 = arith.constant 1.000000e+00 : f32
    %71 = vector.broadcast %cst_24 : f32 to vector<8x32xf32>
    %72 = arith.subf %70, %71 : vector<8x32xf32>
    %73 = vector.extract_strided_slice %65 {offsets = [0, 96], sizes = [8, 32], strides = [1, 1]} : vector<8x128xf32> to vector<8x32xf32>
    %74 = arith.mulf %33, %66 : vector<8x32xf32>
    %75 = arith.mulf %67, %72 : vector<8x32xf32>
    %76 = arith.addf %74, %75 : vector<8x32xf32>
    %77 = math.tanh %76 : vector<8x32xf32>
    %78 = arith.mulf %73, %77 : vector<8x32xf32>
    %cst_25 = arith.constant dense<0.000000e+00> : vector<8x128xf32>
    %79 = tpu.matmul %78, %9, %cst_25 {dimension_numbers = #tpu.dot_dimension_numbers<[1], [0], [0], [1], [0, 0, 1, 1], [], []>} : vector<8x32xf32>, vector<32x128xf32>, vector<8x128xf32> -> vector<8x128xf32>
    %cst_26 = arith.constant dense<0.000000e+00> : vector<8x128xf32>
    %80 = tpu.matmul %57, %10, %cst_26 {dimension_numbers = #tpu.dot_dimension_numbers<[1], [0], [0], [1], [0, 0, 1, 1], [], []>} : vector<8x32xf32>, vector<32x128xf32>, vector<8x128xf32> -> vector<8x128xf32>
    %81 = arith.addf %79, %80 : vector<8x128xf32>
    %82 = arith.addf %81, %13 : vector<8x128xf32>
    %83 = arith.negf %82 : vector<8x128xf32>
    %84 = math.exp %83 : vector<8x128xf32>
    %cst_27 = arith.constant 1.000000e+00 : f32
    %85 = vector.broadcast %cst_27 : f32 to vector<8x128xf32>
    %86 = arith.addf %85, %84 : vector<8x128xf32>
    %87 = arith.divf %85, %86 : vector<8x128xf32>
    %88 = vector.extract_strided_slice %87 {offsets = [0, 0], sizes = [8, 32], strides = [1, 1]} : vector<8x128xf32> to vector<8x32xf32>
    %89 = vector.extract_strided_slice %87 {offsets = [0, 32], sizes = [8, 32], strides = [1, 1]} : vector<8x128xf32> to vector<8x32xf32>
    %90 = vector.extract_strided_slice %87 {offsets = [0, 64], sizes = [8, 32], strides = [1, 1]} : vector<8x128xf32> to vector<8x32xf32>
    %cst_28 = arith.constant 2.000000e+00 : f32
    %91 = vector.broadcast %cst_28 : f32 to vector<8x32xf32>
    %92 = arith.mulf %91, %90 : vector<8x32xf32>
    %cst_29 = arith.constant 1.000000e+00 : f32
    %93 = vector.broadcast %cst_29 : f32 to vector<8x32xf32>
    %94 = arith.subf %92, %93 : vector<8x32xf32>
    %95 = vector.extract_strided_slice %87 {offsets = [0, 96], sizes = [8, 32], strides = [1, 1]} : vector<8x128xf32> to vector<8x32xf32>
    %96 = arith.mulf %55, %88 : vector<8x32xf32>
    %97 = arith.mulf %89, %94 : vector<8x32xf32>
    %98 = arith.addf %96, %97 : vector<8x32xf32>
    %99 = math.tanh %98 : vector<8x32xf32>
    %100 = arith.mulf %95, %99 : vector<8x32xf32>
    %101 = vector.extract_strided_slice %7 {offsets = [16, 0], sizes = [8, 128], strides = [1, 1]} : vector<64x128xf32> to vector<8x128xf32>
    %cst_30 = arith.constant dense<0.000000e+00> : vector<8x128xf32>
    %102 = tpu.matmul %78, %8, %cst_30 {dimension_numbers = #tpu.dot_dimension_numbers<[1], [0], [0], [1], [0, 0, 1, 1], [], []>} : vector<8x32xf32>, vector<32x128xf32>, vector<8x128xf32> -> vector<8x128xf32>
    %103 = arith.addf %101, %102 : vector<8x128xf32>
    %104 = arith.negf %103 : vector<8x128xf32>
    %105 = math.exp %104 : vector<8x128xf32>
    %cst_31 = arith.constant 1.000000e+00 : f32
    %106 = vector.broadcast %cst_31 : f32 to vector<8x128xf32>
    %107 = arith.addf %106, %105 : vector<8x128xf32>
    %108 = arith.divf %106, %107 : vector<8x128xf32>
    %109 = vector.extract_strided_slice %108 {offsets = [0, 0], sizes = [8, 32], strides = [1, 1]} : vector<8x128xf32> to vector<8x32xf32>
    %110 = vector.extract_strided_slice %108 {offsets = [0, 32], sizes = [8, 32], strides = [1, 1]} : vector<8x128xf32> to vector<8x32xf32>
    %111 = vector.extract_strided_slice %108 {offsets = [0, 64], sizes = [8, 32], strides = [1, 1]} : vector<8x128xf32> to vector<8x32xf32>
    %cst_32 = arith.constant 2.000000e+00 : f32
    %112 = vector.broadcast %cst_32 : f32 to vector<8x32xf32>
    %113 = arith.mulf %112, %111 : vector<8x32xf32>
    %cst_33 = arith.constant 1.000000e+00 : f32
    %114 = vector.broadcast %cst_33 : f32 to vector<8x32xf32>
    %115 = arith.subf %113, %114 : vector<8x32xf32>
    %116 = vector.extract_strided_slice %108 {offsets = [0, 96], sizes = [8, 32], strides = [1, 1]} : vector<8x128xf32> to vector<8x32xf32>
    %117 = arith.mulf %76, %109 : vector<8x32xf32>
    %118 = arith.mulf %110, %115 : vector<8x32xf32>
    %119 = arith.addf %117, %118 : vector<8x32xf32>
    %120 = math.tanh %119 : vector<8x32xf32>
    %121 = arith.mulf %116, %120 : vector<8x32xf32>
    %cst_34 = arith.constant dense<0.000000e+00> : vector<8x128xf32>
    %122 = tpu.matmul %121, %9, %cst_34 {dimension_numbers = #tpu.dot_dimension_numbers<[1], [0], [0], [1], [0, 0, 1, 1], [], []>} : vector<8x32xf32>, vector<32x128xf32>, vector<8x128xf32> -> vector<8x128xf32>
    %cst_35 = arith.constant dense<0.000000e+00> : vector<8x128xf32>
    %123 = tpu.matmul %100, %10, %cst_35 {dimension_numbers = #tpu.dot_dimension_numbers<[1], [0], [0], [1], [0, 0, 1, 1], [], []>} : vector<8x32xf32>, vector<32x128xf32>, vector<8x128xf32> -> vector<8x128xf32>
    %124 = arith.addf %122, %123 : vector<8x128xf32>
    %125 = arith.addf %124, %13 : vector<8x128xf32>
    %126 = arith.negf %125 : vector<8x128xf32>
    %127 = math.exp %126 : vector<8x128xf32>
    %cst_36 = arith.constant 1.000000e+00 : f32
    %128 = vector.broadcast %cst_36 : f32 to vector<8x128xf32>
    %129 = arith.addf %128, %127 : vector<8x128xf32>
    %130 = arith.divf %128, %129 : vector<8x128xf32>
    %131 = vector.extract_strided_slice %130 {offsets = [0, 0], sizes = [8, 32], strides = [1, 1]} : vector<8x128xf32> to vector<8x32xf32>
    %132 = vector.extract_strided_slice %130 {offsets = [0, 32], sizes = [8, 32], strides = [1, 1]} : vector<8x128xf32> to vector<8x32xf32>
    %133 = vector.extract_strided_slice %130 {offsets = [0, 64], sizes = [8, 32], strides = [1, 1]} : vector<8x128xf32> to vector<8x32xf32>
    %cst_37 = arith.constant 2.000000e+00 : f32
    %134 = vector.broadcast %cst_37 : f32 to vector<8x32xf32>
    %135 = arith.mulf %134, %133 : vector<8x32xf32>
    %cst_38 = arith.constant 1.000000e+00 : f32
    %136 = vector.broadcast %cst_38 : f32 to vector<8x32xf32>
    %137 = arith.subf %135, %136 : vector<8x32xf32>
    %138 = vector.extract_strided_slice %130 {offsets = [0, 96], sizes = [8, 32], strides = [1, 1]} : vector<8x128xf32> to vector<8x32xf32>
    %139 = arith.mulf %98, %131 : vector<8x32xf32>
    %140 = arith.mulf %132, %137 : vector<8x32xf32>
    %141 = arith.addf %139, %140 : vector<8x32xf32>
    %142 = math.tanh %141 : vector<8x32xf32>
    %143 = arith.mulf %138, %142 : vector<8x32xf32>
    %144 = vector.extract_strided_slice %7 {offsets = [24, 0], sizes = [8, 128], strides = [1, 1]} : vector<64x128xf32> to vector<8x128xf32>
    %cst_39 = arith.constant dense<0.000000e+00> : vector<8x128xf32>
    %145 = tpu.matmul %121, %8, %cst_39 {dimension_numbers = #tpu.dot_dimension_numbers<[1], [0], [0], [1], [0, 0, 1, 1], [], []>} : vector<8x32xf32>, vector<32x128xf32>, vector<8x128xf32> -> vector<8x128xf32>
    %146 = arith.addf %144, %145 : vector<8x128xf32>
    %147 = arith.negf %146 : vector<8x128xf32>
    %148 = math.exp %147 : vector<8x128xf32>
    %cst_40 = arith.constant 1.000000e+00 : f32
    %149 = vector.broadcast %cst_40 : f32 to vector<8x128xf32>
    %150 = arith.addf %149, %148 : vector<8x128xf32>
    %151 = arith.divf %149, %150 : vector<8x128xf32>
    %152 = vector.extract_strided_slice %151 {offsets = [0, 0], sizes = [8, 32], strides = [1, 1]} : vector<8x128xf32> to vector<8x32xf32>
    %153 = vector.extract_strided_slice %151 {offsets = [0, 32], sizes = [8, 32], strides = [1, 1]} : vector<8x128xf32> to vector<8x32xf32>
    %154 = vector.extract_strided_slice %151 {offsets = [0, 64], sizes = [8, 32], strides = [1, 1]} : vector<8x128xf32> to vector<8x32xf32>
    %cst_41 = arith.constant 2.000000e+00 : f32
    %155 = vector.broadcast %cst_41 : f32 to vector<8x32xf32>
    %156 = arith.mulf %155, %154 : vector<8x32xf32>
    %cst_42 = arith.constant 1.000000e+00 : f32
    %157 = vector.broadcast %cst_42 : f32 to vector<8x32xf32>
    %158 = arith.subf %156, %157 : vector<8x32xf32>
    %159 = vector.extract_strided_slice %151 {offsets = [0, 96], sizes = [8, 32], strides = [1, 1]} : vector<8x128xf32> to vector<8x32xf32>
    %160 = arith.mulf %119, %152 : vector<8x32xf32>
    %161 = arith.mulf %153, %158 : vector<8x32xf32>
    %162 = arith.addf %160, %161 : vector<8x32xf32>
    %163 = math.tanh %162 : vector<8x32xf32>
    %164 = arith.mulf %159, %163 : vector<8x32xf32>
    %cst_43 = arith.constant dense<0.000000e+00> : vector<8x128xf32>
    %165 = tpu.matmul %164, %9, %cst_43 {dimension_numbers = #tpu.dot_dimension_numbers<[1], [0], [0], [1], [0, 0, 1, 1], [], []>} : vector<8x32xf32>, vector<32x128xf32>, vector<8x128xf32> -> vector<8x128xf32>
    %cst_44 = arith.constant dense<0.000000e+00> : vector<8x128xf32>
    %166 = tpu.matmul %143, %10, %cst_44 {dimension_numbers = #tpu.dot_dimension_numbers<[1], [0], [0], [1], [0, 0, 1, 1], [], []>} : vector<8x32xf32>, vector<32x128xf32>, vector<8x128xf32> -> vector<8x128xf32>
    %167 = arith.addf %165, %166 : vector<8x128xf32>
    %168 = arith.addf %167, %13 : vector<8x128xf32>
    %169 = arith.negf %168 : vector<8x128xf32>
    %170 = math.exp %169 : vector<8x128xf32>
    %cst_45 = arith.constant 1.000000e+00 : f32
    %171 = vector.broadcast %cst_45 : f32 to vector<8x128xf32>
    %172 = arith.addf %171, %170 : vector<8x128xf32>
    %173 = arith.divf %171, %172 : vector<8x128xf32>
    %174 = vector.extract_strided_slice %173 {offsets = [0, 0], sizes = [8, 32], strides = [1, 1]} : vector<8x128xf32> to vector<8x32xf32>
    %175 = vector.extract_strided_slice %173 {offsets = [0, 32], sizes = [8, 32], strides = [1, 1]} : vector<8x128xf32> to vector<8x32xf32>
    %176 = vector.extract_strided_slice %173 {offsets = [0, 64], sizes = [8, 32], strides = [1, 1]} : vector<8x128xf32> to vector<8x32xf32>
    %cst_46 = arith.constant 2.000000e+00 : f32
    %177 = vector.broadcast %cst_46 : f32 to vector<8x32xf32>
    %178 = arith.mulf %177, %176 : vector<8x32xf32>
    %cst_47 = arith.constant 1.000000e+00 : f32
    %179 = vector.broadcast %cst_47 : f32 to vector<8x32xf32>
    %180 = arith.subf %178, %179 : vector<8x32xf32>
    %181 = vector.extract_strided_slice %173 {offsets = [0, 96], sizes = [8, 32], strides = [1, 1]} : vector<8x128xf32> to vector<8x32xf32>
    %182 = arith.mulf %141, %174 : vector<8x32xf32>
    %183 = arith.mulf %175, %180 : vector<8x32xf32>
    %184 = arith.addf %182, %183 : vector<8x32xf32>
    %185 = math.tanh %184 : vector<8x32xf32>
    %186 = arith.mulf %181, %185 : vector<8x32xf32>
    %187 = vector.extract_strided_slice %7 {offsets = [32, 0], sizes = [8, 128], strides = [1, 1]} : vector<64x128xf32> to vector<8x128xf32>
    %cst_48 = arith.constant dense<0.000000e+00> : vector<8x128xf32>
    %188 = tpu.matmul %164, %8, %cst_48 {dimension_numbers = #tpu.dot_dimension_numbers<[1], [0], [0], [1], [0, 0, 1, 1], [], []>} : vector<8x32xf32>, vector<32x128xf32>, vector<8x128xf32> -> vector<8x128xf32>
    %189 = arith.addf %187, %188 : vector<8x128xf32>
    %190 = arith.negf %189 : vector<8x128xf32>
    %191 = math.exp %190 : vector<8x128xf32>
    %cst_49 = arith.constant 1.000000e+00 : f32
    %192 = vector.broadcast %cst_49 : f32 to vector<8x128xf32>
    %193 = arith.addf %192, %191 : vector<8x128xf32>
    %194 = arith.divf %192, %193 : vector<8x128xf32>
    %195 = vector.extract_strided_slice %194 {offsets = [0, 0], sizes = [8, 32], strides = [1, 1]} : vector<8x128xf32> to vector<8x32xf32>
    %196 = vector.extract_strided_slice %194 {offsets = [0, 32], sizes = [8, 32], strides = [1, 1]} : vector<8x128xf32> to vector<8x32xf32>
    %197 = vector.extract_strided_slice %194 {offsets = [0, 64], sizes = [8, 32], strides = [1, 1]} : vector<8x128xf32> to vector<8x32xf32>
    %cst_50 = arith.constant 2.000000e+00 : f32
    %198 = vector.broadcast %cst_50 : f32 to vector<8x32xf32>
    %199 = arith.mulf %198, %197 : vector<8x32xf32>
    %cst_51 = arith.constant 1.000000e+00 : f32
    %200 = vector.broadcast %cst_51 : f32 to vector<8x32xf32>
    %201 = arith.subf %199, %200 : vector<8x32xf32>
    %202 = vector.extract_strided_slice %194 {offsets = [0, 96], sizes = [8, 32], strides = [1, 1]} : vector<8x128xf32> to vector<8x32xf32>
    %203 = arith.mulf %162, %195 : vector<8x32xf32>
    %204 = arith.mulf %196, %201 : vector<8x32xf32>
    %205 = arith.addf %203, %204 : vector<8x32xf32>
    %206 = math.tanh %205 : vector<8x32xf32>
    %207 = arith.mulf %202, %206 : vector<8x32xf32>
    %cst_52 = arith.constant dense<0.000000e+00> : vector<8x128xf32>
    %208 = tpu.matmul %207, %9, %cst_52 {dimension_numbers = #tpu.dot_dimension_numbers<[1], [0], [0], [1], [0, 0, 1, 1], [], []>} : vector<8x32xf32>, vector<32x128xf32>, vector<8x128xf32> -> vector<8x128xf32>
    %cst_53 = arith.constant dense<0.000000e+00> : vector<8x128xf32>
    %209 = tpu.matmul %186, %10, %cst_53 {dimension_numbers = #tpu.dot_dimension_numbers<[1], [0], [0], [1], [0, 0, 1, 1], [], []>} : vector<8x32xf32>, vector<32x128xf32>, vector<8x128xf32> -> vector<8x128xf32>
    %210 = arith.addf %208, %209 : vector<8x128xf32>
    %211 = arith.addf %210, %13 : vector<8x128xf32>
    %212 = arith.negf %211 : vector<8x128xf32>
    %213 = math.exp %212 : vector<8x128xf32>
    %cst_54 = arith.constant 1.000000e+00 : f32
    %214 = vector.broadcast %cst_54 : f32 to vector<8x128xf32>
    %215 = arith.addf %214, %213 : vector<8x128xf32>
    %216 = arith.divf %214, %215 : vector<8x128xf32>
    %217 = vector.extract_strided_slice %216 {offsets = [0, 0], sizes = [8, 32], strides = [1, 1]} : vector<8x128xf32> to vector<8x32xf32>
    %218 = vector.extract_strided_slice %216 {offsets = [0, 32], sizes = [8, 32], strides = [1, 1]} : vector<8x128xf32> to vector<8x32xf32>
    %219 = vector.extract_strided_slice %216 {offsets = [0, 64], sizes = [8, 32], strides = [1, 1]} : vector<8x128xf32> to vector<8x32xf32>
    %cst_55 = arith.constant 2.000000e+00 : f32
    %220 = vector.broadcast %cst_55 : f32 to vector<8x32xf32>
    %221 = arith.mulf %220, %219 : vector<8x32xf32>
    %cst_56 = arith.constant 1.000000e+00 : f32
    %222 = vector.broadcast %cst_56 : f32 to vector<8x32xf32>
    %223 = arith.subf %221, %222 : vector<8x32xf32>
    %224 = vector.extract_strided_slice %216 {offsets = [0, 96], sizes = [8, 32], strides = [1, 1]} : vector<8x128xf32> to vector<8x32xf32>
    %225 = arith.mulf %184, %217 : vector<8x32xf32>
    %226 = arith.mulf %218, %223 : vector<8x32xf32>
    %227 = arith.addf %225, %226 : vector<8x32xf32>
    %228 = math.tanh %227 : vector<8x32xf32>
    %229 = arith.mulf %224, %228 : vector<8x32xf32>
    %230 = vector.extract_strided_slice %7 {offsets = [40, 0], sizes = [8, 128], strides = [1, 1]} : vector<64x128xf32> to vector<8x128xf32>
    %cst_57 = arith.constant dense<0.000000e+00> : vector<8x128xf32>
    %231 = tpu.matmul %207, %8, %cst_57 {dimension_numbers = #tpu.dot_dimension_numbers<[1], [0], [0], [1], [0, 0, 1, 1], [], []>} : vector<8x32xf32>, vector<32x128xf32>, vector<8x128xf32> -> vector<8x128xf32>
    %232 = arith.addf %230, %231 : vector<8x128xf32>
    %233 = arith.negf %232 : vector<8x128xf32>
    %234 = math.exp %233 : vector<8x128xf32>
    %cst_58 = arith.constant 1.000000e+00 : f32
    %235 = vector.broadcast %cst_58 : f32 to vector<8x128xf32>
    %236 = arith.addf %235, %234 : vector<8x128xf32>
    %237 = arith.divf %235, %236 : vector<8x128xf32>
    %238 = vector.extract_strided_slice %237 {offsets = [0, 0], sizes = [8, 32], strides = [1, 1]} : vector<8x128xf32> to vector<8x32xf32>
    %239 = vector.extract_strided_slice %237 {offsets = [0, 32], sizes = [8, 32], strides = [1, 1]} : vector<8x128xf32> to vector<8x32xf32>
    %240 = vector.extract_strided_slice %237 {offsets = [0, 64], sizes = [8, 32], strides = [1, 1]} : vector<8x128xf32> to vector<8x32xf32>
    %cst_59 = arith.constant 2.000000e+00 : f32
    %241 = vector.broadcast %cst_59 : f32 to vector<8x32xf32>
    %242 = arith.mulf %241, %240 : vector<8x32xf32>
    %cst_60 = arith.constant 1.000000e+00 : f32
    %243 = vector.broadcast %cst_60 : f32 to vector<8x32xf32>
    %244 = arith.subf %242, %243 : vector<8x32xf32>
    %245 = vector.extract_strided_slice %237 {offsets = [0, 96], sizes = [8, 32], strides = [1, 1]} : vector<8x128xf32> to vector<8x32xf32>
    %246 = arith.mulf %205, %238 : vector<8x32xf32>
    %247 = arith.mulf %239, %244 : vector<8x32xf32>
    %248 = arith.addf %246, %247 : vector<8x32xf32>
    %249 = math.tanh %248 : vector<8x32xf32>
    %250 = arith.mulf %245, %249 : vector<8x32xf32>
    %cst_61 = arith.constant dense<0.000000e+00> : vector<8x128xf32>
    %251 = tpu.matmul %250, %9, %cst_61 {dimension_numbers = #tpu.dot_dimension_numbers<[1], [0], [0], [1], [0, 0, 1, 1], [], []>} : vector<8x32xf32>, vector<32x128xf32>, vector<8x128xf32> -> vector<8x128xf32>
    %cst_62 = arith.constant dense<0.000000e+00> : vector<8x128xf32>
    %252 = tpu.matmul %229, %10, %cst_62 {dimension_numbers = #tpu.dot_dimension_numbers<[1], [0], [0], [1], [0, 0, 1, 1], [], []>} : vector<8x32xf32>, vector<32x128xf32>, vector<8x128xf32> -> vector<8x128xf32>
    %253 = arith.addf %251, %252 : vector<8x128xf32>
    %254 = arith.addf %253, %13 : vector<8x128xf32>
    %255 = arith.negf %254 : vector<8x128xf32>
    %256 = math.exp %255 : vector<8x128xf32>
    %cst_63 = arith.constant 1.000000e+00 : f32
    %257 = vector.broadcast %cst_63 : f32 to vector<8x128xf32>
    %258 = arith.addf %257, %256 : vector<8x128xf32>
    %259 = arith.divf %257, %258 : vector<8x128xf32>
    %260 = vector.extract_strided_slice %259 {offsets = [0, 0], sizes = [8, 32], strides = [1, 1]} : vector<8x128xf32> to vector<8x32xf32>
    %261 = vector.extract_strided_slice %259 {offsets = [0, 32], sizes = [8, 32], strides = [1, 1]} : vector<8x128xf32> to vector<8x32xf32>
    %262 = vector.extract_strided_slice %259 {offsets = [0, 64], sizes = [8, 32], strides = [1, 1]} : vector<8x128xf32> to vector<8x32xf32>
    %cst_64 = arith.constant 2.000000e+00 : f32
    %263 = vector.broadcast %cst_64 : f32 to vector<8x32xf32>
    %264 = arith.mulf %263, %262 : vector<8x32xf32>
    %cst_65 = arith.constant 1.000000e+00 : f32
    %265 = vector.broadcast %cst_65 : f32 to vector<8x32xf32>
    %266 = arith.subf %264, %265 : vector<8x32xf32>
    %267 = vector.extract_strided_slice %259 {offsets = [0, 96], sizes = [8, 32], strides = [1, 1]} : vector<8x128xf32> to vector<8x32xf32>
    %268 = arith.mulf %227, %260 : vector<8x32xf32>
    %269 = arith.mulf %261, %266 : vector<8x32xf32>
    %270 = arith.addf %268, %269 : vector<8x32xf32>
    %271 = math.tanh %270 : vector<8x32xf32>
    %272 = arith.mulf %267, %271 : vector<8x32xf32>
    %273 = vector.extract_strided_slice %7 {offsets = [48, 0], sizes = [8, 128], strides = [1, 1]} : vector<64x128xf32> to vector<8x128xf32>
    %cst_66 = arith.constant dense<0.000000e+00> : vector<8x128xf32>
    %274 = tpu.matmul %250, %8, %cst_66 {dimension_numbers = #tpu.dot_dimension_numbers<[1], [0], [0], [1], [0, 0, 1, 1], [], []>} : vector<8x32xf32>, vector<32x128xf32>, vector<8x128xf32> -> vector<8x128xf32>
    %275 = arith.addf %273, %274 : vector<8x128xf32>
    %276 = arith.negf %275 : vector<8x128xf32>
    %277 = math.exp %276 : vector<8x128xf32>
    %cst_67 = arith.constant 1.000000e+00 : f32
    %278 = vector.broadcast %cst_67 : f32 to vector<8x128xf32>
    %279 = arith.addf %278, %277 : vector<8x128xf32>
    %280 = arith.divf %278, %279 : vector<8x128xf32>
    %281 = vector.extract_strided_slice %280 {offsets = [0, 0], sizes = [8, 32], strides = [1, 1]} : vector<8x128xf32> to vector<8x32xf32>
    %282 = vector.extract_strided_slice %280 {offsets = [0, 32], sizes = [8, 32], strides = [1, 1]} : vector<8x128xf32> to vector<8x32xf32>
    %283 = vector.extract_strided_slice %280 {offsets = [0, 64], sizes = [8, 32], strides = [1, 1]} : vector<8x128xf32> to vector<8x32xf32>
    %cst_68 = arith.constant 2.000000e+00 : f32
    %284 = vector.broadcast %cst_68 : f32 to vector<8x32xf32>
    %285 = arith.mulf %284, %283 : vector<8x32xf32>
    %cst_69 = arith.constant 1.000000e+00 : f32
    %286 = vector.broadcast %cst_69 : f32 to vector<8x32xf32>
    %287 = arith.subf %285, %286 : vector<8x32xf32>
    %288 = vector.extract_strided_slice %280 {offsets = [0, 96], sizes = [8, 32], strides = [1, 1]} : vector<8x128xf32> to vector<8x32xf32>
    %289 = arith.mulf %248, %281 : vector<8x32xf32>
    %290 = arith.mulf %282, %287 : vector<8x32xf32>
    %291 = arith.addf %289, %290 : vector<8x32xf32>
    %292 = math.tanh %291 : vector<8x32xf32>
    %293 = arith.mulf %288, %292 : vector<8x32xf32>
    %cst_70 = arith.constant dense<0.000000e+00> : vector<8x128xf32>
    %294 = tpu.matmul %293, %9, %cst_70 {dimension_numbers = #tpu.dot_dimension_numbers<[1], [0], [0], [1], [0, 0, 1, 1], [], []>} : vector<8x32xf32>, vector<32x128xf32>, vector<8x128xf32> -> vector<8x128xf32>
    %cst_71 = arith.constant dense<0.000000e+00> : vector<8x128xf32>
    %295 = tpu.matmul %272, %10, %cst_71 {dimension_numbers = #tpu.dot_dimension_numbers<[1], [0], [0], [1], [0, 0, 1, 1], [], []>} : vector<8x32xf32>, vector<32x128xf32>, vector<8x128xf32> -> vector<8x128xf32>
    %296 = arith.addf %294, %295 : vector<8x128xf32>
    %297 = arith.addf %296, %13 : vector<8x128xf32>
    %298 = arith.negf %297 : vector<8x128xf32>
    %299 = math.exp %298 : vector<8x128xf32>
    %cst_72 = arith.constant 1.000000e+00 : f32
    %300 = vector.broadcast %cst_72 : f32 to vector<8x128xf32>
    %301 = arith.addf %300, %299 : vector<8x128xf32>
    %302 = arith.divf %300, %301 : vector<8x128xf32>
    %303 = vector.extract_strided_slice %302 {offsets = [0, 0], sizes = [8, 32], strides = [1, 1]} : vector<8x128xf32> to vector<8x32xf32>
    %304 = vector.extract_strided_slice %302 {offsets = [0, 32], sizes = [8, 32], strides = [1, 1]} : vector<8x128xf32> to vector<8x32xf32>
    %305 = vector.extract_strided_slice %302 {offsets = [0, 64], sizes = [8, 32], strides = [1, 1]} : vector<8x128xf32> to vector<8x32xf32>
    %cst_73 = arith.constant 2.000000e+00 : f32
    %306 = vector.broadcast %cst_73 : f32 to vector<8x32xf32>
    %307 = arith.mulf %306, %305 : vector<8x32xf32>
    %cst_74 = arith.constant 1.000000e+00 : f32
    %308 = vector.broadcast %cst_74 : f32 to vector<8x32xf32>
    %309 = arith.subf %307, %308 : vector<8x32xf32>
    %310 = vector.extract_strided_slice %302 {offsets = [0, 96], sizes = [8, 32], strides = [1, 1]} : vector<8x128xf32> to vector<8x32xf32>
    %311 = arith.mulf %270, %303 : vector<8x32xf32>
    %312 = arith.mulf %304, %309 : vector<8x32xf32>
    %313 = arith.addf %311, %312 : vector<8x32xf32>
    %314 = math.tanh %313 : vector<8x32xf32>
    %315 = arith.mulf %310, %314 : vector<8x32xf32>
    %316 = vector.extract_strided_slice %7 {offsets = [56, 0], sizes = [8, 128], strides = [1, 1]} : vector<64x128xf32> to vector<8x128xf32>
    %cst_75 = arith.constant dense<0.000000e+00> : vector<8x128xf32>
    %317 = tpu.matmul %293, %8, %cst_75 {dimension_numbers = #tpu.dot_dimension_numbers<[1], [0], [0], [1], [0, 0, 1, 1], [], []>} : vector<8x32xf32>, vector<32x128xf32>, vector<8x128xf32> -> vector<8x128xf32>
    %318 = arith.addf %316, %317 : vector<8x128xf32>
    %319 = arith.negf %318 : vector<8x128xf32>
    %320 = math.exp %319 : vector<8x128xf32>
    %cst_76 = arith.constant 1.000000e+00 : f32
    %321 = vector.broadcast %cst_76 : f32 to vector<8x128xf32>
    %322 = arith.addf %321, %320 : vector<8x128xf32>
    %323 = arith.divf %321, %322 : vector<8x128xf32>
    %324 = vector.extract_strided_slice %323 {offsets = [0, 0], sizes = [8, 32], strides = [1, 1]} : vector<8x128xf32> to vector<8x32xf32>
    %325 = vector.extract_strided_slice %323 {offsets = [0, 32], sizes = [8, 32], strides = [1, 1]} : vector<8x128xf32> to vector<8x32xf32>
    %326 = vector.extract_strided_slice %323 {offsets = [0, 64], sizes = [8, 32], strides = [1, 1]} : vector<8x128xf32> to vector<8x32xf32>
    %cst_77 = arith.constant 2.000000e+00 : f32
    %327 = vector.broadcast %cst_77 : f32 to vector<8x32xf32>
    %328 = arith.mulf %327, %326 : vector<8x32xf32>
    %cst_78 = arith.constant 1.000000e+00 : f32
    %329 = vector.broadcast %cst_78 : f32 to vector<8x32xf32>
    %330 = arith.subf %328, %329 : vector<8x32xf32>
    %331 = vector.extract_strided_slice %323 {offsets = [0, 96], sizes = [8, 32], strides = [1, 1]} : vector<8x128xf32> to vector<8x32xf32>
    %332 = arith.mulf %291, %324 : vector<8x32xf32>
    %333 = arith.mulf %325, %330 : vector<8x32xf32>
    %334 = arith.addf %332, %333 : vector<8x32xf32>
    %335 = math.tanh %334 : vector<8x32xf32>
    %336 = arith.mulf %331, %335 : vector<8x32xf32>
    %cst_79 = arith.constant dense<0.000000e+00> : vector<8x128xf32>
    %337 = tpu.matmul %336, %9, %cst_79 {dimension_numbers = #tpu.dot_dimension_numbers<[1], [0], [0], [1], [0, 0, 1, 1], [], []>} : vector<8x32xf32>, vector<32x128xf32>, vector<8x128xf32> -> vector<8x128xf32>
    %cst_80 = arith.constant dense<0.000000e+00> : vector<8x128xf32>
    %338 = tpu.matmul %315, %10, %cst_80 {dimension_numbers = #tpu.dot_dimension_numbers<[1], [0], [0], [1], [0, 0, 1, 1], [], []>} : vector<8x32xf32>, vector<32x128xf32>, vector<8x128xf32> -> vector<8x128xf32>
    %339 = arith.addf %337, %338 : vector<8x128xf32>
    %340 = arith.addf %339, %13 : vector<8x128xf32>
    %341 = arith.negf %340 : vector<8x128xf32>
    %342 = math.exp %341 : vector<8x128xf32>
    %cst_81 = arith.constant 1.000000e+00 : f32
    %343 = vector.broadcast %cst_81 : f32 to vector<8x128xf32>
    %344 = arith.addf %343, %342 : vector<8x128xf32>
    %345 = arith.divf %343, %344 : vector<8x128xf32>
    %346 = vector.extract_strided_slice %345 {offsets = [0, 0], sizes = [8, 32], strides = [1, 1]} : vector<8x128xf32> to vector<8x32xf32>
    %347 = vector.extract_strided_slice %345 {offsets = [0, 32], sizes = [8, 32], strides = [1, 1]} : vector<8x128xf32> to vector<8x32xf32>
    %348 = vector.extract_strided_slice %345 {offsets = [0, 64], sizes = [8, 32], strides = [1, 1]} : vector<8x128xf32> to vector<8x32xf32>
    %cst_82 = arith.constant 2.000000e+00 : f32
    %349 = vector.broadcast %cst_82 : f32 to vector<8x32xf32>
    %350 = arith.mulf %349, %348 : vector<8x32xf32>
    %cst_83 = arith.constant 1.000000e+00 : f32
    %351 = vector.broadcast %cst_83 : f32 to vector<8x32xf32>
    %352 = arith.subf %350, %351 : vector<8x32xf32>
    %353 = vector.extract_strided_slice %345 {offsets = [0, 96], sizes = [8, 32], strides = [1, 1]} : vector<8x128xf32> to vector<8x32xf32>
    %354 = arith.mulf %313, %346 : vector<8x32xf32>
    %355 = arith.mulf %347, %352 : vector<8x32xf32>
    %356 = arith.addf %354, %355 : vector<8x32xf32>
    %357 = math.tanh %356 : vector<8x32xf32>
    %358 = arith.mulf %353, %357 : vector<8x32xf32>
    %c0_84 = arith.constant 0 : index
    %c0_85 = arith.constant 0 : index
    %359 = vector.load %arg6[%c0_84, %c0_85] : memref<32x32xf32, #tpu.memory_space<vmem>>, vector<32x32xf32>
    %cst_86 = arith.constant dense<0.000000e+00> : vector<8x32xf32>
    %360 = tpu.matmul %358, %359, %cst_86 {dimension_numbers = #tpu.dot_dimension_numbers<[1], [0], [0], [1], [0, 0, 1, 1], [], []>} : vector<8x32xf32>, vector<32x32xf32>, vector<8x32xf32> -> vector<8x32xf32>
    %c0_87 = arith.constant 0 : index
    %c0_88 = arith.constant 0 : index
    %361 = vector.load %arg7[%c0_87, %c0_88] : memref<1x32xf32, #tpu.memory_space<vmem>>, vector<1x32xf32>
    %362 = vector.broadcast %361 : vector<1x32xf32> to vector<8x32xf32>
    %363 = arith.addf %360, %362 : vector<8x32xf32>
    %c0_89 = arith.constant 0 : index
    %c0_90 = arith.constant 0 : index
    %364 = vector.load %arg8[%c0_89, %c0_90] : memref<8x32xf32, #tpu.memory_space<vmem>>, vector<8x32xf32>
    tpu.vector_store %arg8[%c0_89, %c0_90], %363 {strides = array<i32>} : memref<8x32xf32, #tpu.memory_space<vmem>>, vector<8x32xf32>,
    return
  }
}

</mosaic_0001>

<bundles_post_ra>
// kernel: tpu_custom_call.1
= control target key start
LH: loop header
LB: loop body
LE: loop exit
PB: predicated region body
PF: predicated region fallthrough
CT: control target
= control target key end

     0   :  { %13 = vsyncpa [#allocation3], 0  ;;  %s2163_s0 = inlined_call_operand.vmem [shape: s32[64,1], index: 0, kind: input, shape index: {}]   ;;  %s2164_s1 = inlined_call_operand.vmem [shape: f32[32,128], index: 1, kind: input, shape index: {}]   ;;  %s2165_s2 = inlined_call_operand.vmem [shape: f32[32,128], index: 2, kind: input, shape index: {}]   ;;  %s2166_s3 = inlined_call_operand.hbm [shape: f32[32,128], index: 3, kind: input, shape index: {}]   ;;  %s2167_s4 = inlined_call_operand.hbm [shape: f32[32,128], index: 4, kind: input, shape index: {}]   ;;  %s2168_s5 = inlined_call_operand.vmem [shape: f32[1,128], index: 5, kind: input, shape index: {}]   ;;  %s2169_s6 = inlined_call_operand.hbm [shape: f32[32,32], index: 6, kind: input, shape index: {}]   ;;  %s2170_s7 = inlined_call_operand.vmem [shape: f32[1,32], index: 7, kind: input, shape index: {}]   ;;  %s2171_s8 = inlined_call_operand.hbm [shape: f32[8,32], index: 8, kind: output, shape index: {}]  }
   0x1   :  { %14 = vsyncpa [#allocation6], 0 }
   0x2   :  { %15 = vsyncpa [#allocation4], 0  ;;  %s39_s29 = sshll.u32 %s2167_s4, 4  ;;  %s1747_s30 = smov [#allocation5]   ;;  %s40_s29 = int_to_ptr.hbm [resolvable:$true] %s39_s29 }
   0x3   :  { %s41_s9 = sshll.u32 %s1747_s30, 4  ;;  %s26_s12 = sshll.u32 %s2166_s3, 4  ;;  %s42_s9 = int_to_ptr.vmem [resolvable:$true] %s41_s9  ;;  %s27_s12 = int_to_ptr.hbm [resolvable:$true] %s26_s12 }
   0x4   :  { %s1748_s13 = smov 128   ;;  %s1749_s14 = smov 8  }
   0x5   :  { %47 = dma.hbm_to_vmem [thread:$0]  %s40_s29, 512, %s42_s9, [#allocation6], %s1748_s13, %s1748_s13, %s1749_s14  }
   0x6   :  { %s1750_s15 = smov [#allocation2]   ;;  %s54_s19 = sshll.u32 %s2169_s6, 4  ;;  %s55_s19 = int_to_ptr.hbm [resolvable:$true] %s54_s19 }
   0x7   :  { %s28_s16 = sshll.u32 %s1750_s15, 4  ;;  %s1751_s4 = smov [#allocation7]   ;;  %s29_s16 = int_to_ptr.vmem [resolvable:$true] %s28_s16 }
   0x8   :  { %34 = dma.hbm_to_vmem [thread:$0]  %s27_s12, 512, %s29_s16, [#allocation3], %s1748_s13, %s1748_s13, %s1749_s14  }
   0x9   :  { %s56_s20 = sshll.u32 %s1751_s4, 4  ;;  %s57_s20 = int_to_ptr.vmem [resolvable:$true] %s56_s20 }
   0xa   :  { %62 = dma.hbm_to_vmem [thread:$0]  %s55_s19, 512, %s57_s20, [#allocation6], %s1748_s13, %s1748_s13, %s1749_s14  }
   0xb   :  { %1741 = dma.done.wait [#allocation3], 512  }
   0xc   :  { %1742 = vsyncadd [#allocation3], 4294966784 }
   0xd   :  { %1743 = dma.done.wait [#allocation6], 1024  }
   0xe   :  { %1744 = vsyncadd [#allocation6], 4294966272  ;;  %v1752_v0 = vmov 0   ;;  %v77_v1 = vld [vmem:[%s2163_s0] sm:$0xff]  ;;  %v138_v2 = vld [vmem:[%s2164_s1 + $0x18] sm:$0xff]  ;;  %v1753_v10 = vmov 0.0   ;;  %v85_v11 = vlaneseq }
   0xf   :  { %1536 = vset.pattern.permute.xlu0 %v1752_v0  ;;  %1537 = vset.pattern.permute.xlu2 %v1752_v0  ;;  %v1820_v3 = vld [vmem:[%s2165_s2 + $0x18] sm:$0xff]  ;;  %v137_v4 = vld [vmem:[%s2164_s1 + $0x10] sm:$0xff]  ;;  %v136_v6 = vld [vmem:[%s2164_s1 + $0x8] sm:$0xff]  ;;  %vm139_vm0 = vcmask 261120   ;;  %s1756_s30 = smov [#allocation8]   ;;  %s1444_s12 = sshll.u32 %s2171_s8, 4  ;;  %s1445_s12 = int_to_ptr.hbm [resolvable:$true] %s1444_s12 }
  0x10   :  { %88 = vperm.xlu0 %1536, %v77_v1   ;;  %176 = vmatpush.msra.mxu0 %v138_v2  ;;  %v1828_v5 = vld [vmem:[%s2165_s2 + $0x10] sm:$0xff]  ;;  %v1837_v7 = vld [vmem:[%s2165_s2 + $0x8] sm:$0xff]  ;;  %v135_v8 = vld [vmem:[%s2164_s1] sm:$0xff]  ;;  %v1859_v12 = vand.u32 127, %v85_v11  ;;  %s1754_s1 = smov 96   ;;  %s1442_s9 = sshll.u32 %s1756_s30, 4  ;;  %s1443_s9 = int_to_ptr.vmem [resolvable:$true] %s1442_s9 }
  0x11   :  { %236 = vmatpush.msra.mxu1 %v1820_v3  ;;  %v1847_v9 = vld [vmem:[%s2165_s2] sm:$0xff]  ;;  %v1870_v39 = vld [vmem:[#allocation5 + $0x18] sm:$0xff]  ;;  %v1874_v41 = vld [vmem:[#allocation5 + $0x10] sm:$0xff]  ;;  %s1755_s2 = smov 32  }
  0x12   :  { %177 = vmatpush.msra.mxu0 %v137_v4  ;;  %v1872_v40 = vld [vmem:[#allocation2 + $0x18] sm:$0xff]  ;;  %295 = vmatpush.msra.mxu2 %v1870_v39  ;;  %v1878_v42 = vld [vmem:[#allocation2 + $0x10] sm:$0xff]  ;;  %v1880_v43 = vld [vmem:[#allocation5 + $0x8] sm:$0xff] }
  0x13   :  { %237 = vmatpush.msra.mxu1 %v1828_v5  ;;  %320 = vmatpush.msra.mxu3 %v1872_v40  ;;  %v1882_v44 = vld [vmem:[#allocation2 + $0x8] sm:$0xff]  ;;  %v1886_v45 = vld [vmem:[#allocation5] sm:$0xff] }
  0x14   :  { %178 = vmatpush.msra.mxu0 %v136_v6  ;;  %296 = vmatpush.msra.mxu2 %v1874_v41  ;;  %v1888_v46 = vld [vmem:[#allocation2] sm:$0xff]  ;;  %v78_v49 = vld [vmem:[%s2163_s0 + $0x8] sm:$0xff] }
  0x15   :  { %238 = vmatpush.msra.mxu1 %v1837_v7  ;;  %321 = vmatpush.msra.mxu3 %v1878_v42  ;;  %v1927_v54 = vld [vmem:[%s2168_s5] ss:$0 sm:$0xff] }
  0x16   :  { %179 = vmatpush.msra.mxu0 %v135_v8  ;;  %297 = vmatpush.msra.mxu2 %v1880_v43 }
  0x17   :  { %239 = vmatpush.msra.mxu1 %v1847_v9  ;;  %322 = vmatpush.msra.mxu3 %v1882_v44 }
  0x18   :  { %240 = vmatmul.f32.vlgmr.msra.gmra.mxu1 %v1753_v10  ;;  %298 = vmatpush.msra.mxu2 %v1886_v45 }
  0x19   :  { %379 = vmatpush.msrb.mxu1 %v1820_v3  ;;  %323 = vmatpush.msra.mxu3 %v1888_v46 }
  0x1a   :  { %299 = vmatmul.f32.vlgmr.msra.gmra.mxu2 %v1753_v10 }
  0x1b   :  { %380 = vmatpush.msrb.mxu1 %v1828_v5  ;;  %468 = vmatpush.msrb.mxu3 %v1872_v40 }
  0x1c   :  { %443 = vmatpush.msrb.mxu2 %v1870_v39 }
  0x1d   :  { %381 = vmatpush.msrb.mxu1 %v1837_v7  ;;  %469 = vmatpush.msrb.mxu3 %v1878_v42 }
  0x1e   :  { %444 = vmatpush.msrb.mxu2 %v1874_v41 }
  0x1f   :  { %382 = vmatpush.msrb.mxu1 %v1847_v9  ;;  %470 = vmatpush.msrb.mxu3 %v1882_v44 }
  0x20   :  { %445 = vmatpush.msrb.mxu2 %v1880_v43 }
  0x21   :  { %527 = vmatpush.msra.mxu1 %v1820_v3  ;;  %471 = vmatpush.msrb.mxu3 %v1888_v46 }
  0x22   :  { %446 = vmatpush.msrb.mxu2 %v1886_v45 }
  0x23   :  { %528 = vmatpush.msra.mxu1 %v1828_v5 }
  0x24   :  { %591 = vmatpush.msra.mxu2 %v1870_v39 }
  0x25   :  { %529 = vmatpush.msra.mxu1 %v1837_v7 }
  0x26   :  { %592 = vmatpush.msra.mxu2 %v1874_v41 }
  0x27   :  { %530 = vmatpush.msra.mxu1 %v1847_v9 }
  0x28   :  { %593 = vmatpush.msra.mxu2 %v1880_v43 }
  0x2a   :  { %594 = vmatpush.msra.mxu2 %v1886_v45 }
  0x82   :  { %v89_v13 = vpop.permute.xlu0 %88 }
  0x83   :  { %vm111_vm1 = vcmp.eq.s32.totalorder %v1859_v12, %v89_v13 }
  0x84   :  { %v1455_v14 = vsel %vm111_vm1, 1.0, %v1753_v10 }
  0x85   :  { %1463 = vmatmul.msk.f32.vlgmr.msra.gmra.mxu0 %vm139_vm0, %v1455_v14 }
  0x95   :  { %v241_v15 = vpop.f32.mrf.mxu1 }
  0x9d   :  { %v300_v53 = vpop.f32.mrf.mxu2 }
 0x102   :  { %v181_v16 = vpop.f32.mrf.mxu0 }
 0x103   :  { %v244_v17 = vadd.f32 %v241_v15, %v181_v16 }
 0x105   :  { %v1471_v18 = vmul.f32 -1.442695, %v244_v17 }
 0x107   :  { %1540 = vpow2.f32 %v1471_v18 }
 0x10d   :  { %v1541_v19 = vpop.eup %1540 }
 0x10e   :  { %v248_v20 = vadd.f32 1.0, %v1541_v19 }
 0x110   :  { %1542 = vrcp.f32 %v248_v20  ;;  %v260_v24 = vand.u32 2147483648, %v248_v20  ;;  %v258_v26 = vand.u32 2147483647, %v248_v20  ;;  %vm254_vm3 = vweird.f32 %v248_v20 }
 0x112   :  { %v261_v28 = vor.u32 1.1754944e-38, %v260_v24  ;;  %vm259_vm5 = vcmp.eq.f32.partialorder %v258_v26, 8.507059e+37 }
 0x116   :  { %v1543_v21 = vpop.eup %1542 }
 0x117   :  { %v250_v22 = vmul.f32 %v1543_v21, %v248_v20  ;;  %vm255_vm2 = vweird.f32 %v1543_v21 }
 0x118   :  { %vm256_vm4 = vmor %vm254_vm3, %vm255_vm2 }
 0x119   :  { %v251_v23 = vsub.f32 1.0, %v250_v22 }
 0x11b   :  { %v252_v25 = vmul.f32 %v1543_v21, %v251_v23 }
 0x11d   :  { %v253_v27 = vadd.f32 %v1543_v21, %v252_v25 }
 0x11f   :  { %v257_v29 = vsel %vm256_vm4, %v1543_v21, %v253_v27 }
 0x120   :  { %v262_v30 = vsel %vm259_vm5, %v261_v28, %v257_v29 }
 0x121   :  { %v264_v31 = vmul.f32 2.0, %v262_v30  ;;  %v266_v35 = vmul.f32 0.0, %v262_v30 }
 0x123   :  { %v1472_v32 = vadd.f32 -1.0, %v264_v31 }
 0x125   :  { %268 = vrot.lane.b32.xlu0 %v1472_v32, %s1754_s1 }
 0x197   :  { %v269_v33 = vpop.permute.xlu0 %268 }
 0x198   :  { %v271_v34 = vmul.f32 %v269_v33, %v262_v30 }
 0x19a   :  { %273 = vrot.lane.b32.xlu1 %v271_v34, %s1754_s1 }
 0x20c   :  { %v274_v36 = vpop.permute.xlu1 %273 }
 0x20d   :  { %v1866_v37 = vadd.f32 %v274_v36, %v266_v35 }
 0x20f   :  { %1544 = vtanh.f32 %v1866_v37 }
 0x215   :  { %v1545_v38 = vpop.eup %1544 }
 0x216   :  { %279 = vrot.lane.b32.xlu1 %v1545_v38, %s1754_s1 }
 0x288   :  { %v280_v47 = vpop.permute.xlu1 %279 }
 0x289   :  { %v282_v48 = vmul.f32 %v280_v47, %v262_v30 }
 0x28b   :  { %304 = vrot.lane.b32.xlu2 %v282_v48, %s1755_s2 }
 0x293   :  { %91 = vperm.xlu2 %1537, %v78_v49  }
 0x2e5   :  { %v305_v50 = vpop.permute.xlu2 %304 }
 0x2e6   :  { %1473 = vmatmul.msk.f32.vlgmr.msra.gmra.mxu3 %vm139_vm0, %v305_v50  ;;  %1476 = vmatmul.msk.f32.vlgmr.msrb.gmra.mxu1 %vm139_vm0, %v305_v50 }
 0x2e7   :  { %616 = vmatpush.msra.mxu3 %v1872_v40  ;;  %675 = vmatpush.msrb.mxu1 %v1820_v3 }
 0x2e9   :  { %617 = vmatpush.msra.mxu3 %v1878_v42  ;;  %676 = vmatpush.msrb.mxu1 %v1828_v5 }
 0x2eb   :  { %618 = vmatpush.msra.mxu3 %v1882_v44  ;;  %677 = vmatpush.msrb.mxu1 %v1837_v7 }
 0x2ed   :  { %v92_v51 = vpop.permute.xlu2 %91  ;;  %619 = vmatpush.msra.mxu3 %v1888_v46  ;;  %678 = vmatpush.msrb.mxu1 %v1847_v9 }
 0x2ee   :  { %vm112_vm6 = vcmp.eq.s32.totalorder %v1859_v12, %v92_v51 }
 0x2ef   :  { %v1456_v52 = vsel %vm112_vm6, 1.0, %v1753_v10 }
 0x2f0   :  { %1464 = vmatmul.msk.f32.gmra.mxu0 %vm139_vm0, %v1456_v52 }
 0x363   :  { %v384_v58 = vpop.f32.mrf.mxu1 }
 0x369   :  { %v325_v55 = vpop.f32.mrf.mxu3 }
 0x36a   :  { %v326_v56 = vadd.f32 %v325_v55, %v300_v53  ;;  %v79_v55 = vld [vmem:[%s2163_s0 + $0x10] sm:$0xff] }
 0x36c   :  { %v328_v57 = vadd.f32 %v1927_v54, %v326_v56 }
 0x36d   :  { %v184_v59 = vpop.f32.mrf.mxu0 }
 0x36e   :  { %v1474_v60 = vmul.f32 -1.442695, %v328_v57  ;;  %v387_v61 = vadd.f32 %v384_v58, %v184_v59 }
 0x370   :  { %1546 = vpow2.f32 %v1474_v60  ;;  %v1477_v62 = vmul.f32 -1.442695, %v387_v61 }
 0x372   :  { %1548 = vpow2.f32 %v1477_v62 }
 0x376   :  { %v1547_v63 = vpop.eup %1546 }
 0x377   :  { %v332_v0 = vadd.f32 1.0, %v1547_v63 }
 0x378   :  { %v1549_v1 = vpop.eup %1548 }
 0x379   :  { %1550 = vrcp.f32 %v332_v0  ;;  %v391_v2 = vadd.f32 1.0, %v1549_v1  ;;  %v344_v14 = vand.u32 2147483648, %v332_v0  ;;  %v342_v17 = vand.u32 2147483647, %v332_v0 }
 0x37a   :  { %vm338_vm8 = vweird.f32 %v332_v0 }
 0x37b   :  { %1552 = vrcp.f32 %v391_v2  ;;  %v403_v18 = vand.u32 2147483648, %v391_v2  ;;  %v401_v21 = vand.u32 2147483647, %v391_v2  ;;  %v345_v22 = vor.u32 1.1754944e-38, %v344_v14 }
 0x37c   :  { %vm343_vm11 = vcmp.eq.f32.partialorder %v342_v17, 8.507059e+37  ;;  %vm397_vm12 = vweird.f32 %v391_v2 }
 0x37d   :  { %v404_v26 = vor.u32 1.1754944e-38, %v403_v18  ;;  %vm402_vm14 = vcmp.eq.f32.partialorder %v401_v21, 8.507059e+37 }
 0x37f   :  { %v1551_v4 = vpop.eup %1550 }
 0x380   :  { %v334_v6 = vmul.f32 %v1551_v4, %v332_v0  ;;  %vm339_vm7 = vweird.f32 %v1551_v4 }
 0x381   :  { %v1553_v8 = vpop.eup %1552  ;;  %vm340_vm10 = vmor %vm338_vm8, %vm339_vm7 }
 0x382   :  { %v335_v11 = vsub.f32 1.0, %v334_v6  ;;  %v393_v13 = vmul.f32 %v1553_v8, %v391_v2  ;;  %vm398_vm9 = vweird.f32 %v1553_v8 }
 0x383   :  { %vm399_vm13 = vmor %vm397_vm12, %vm398_vm9 }
 0x384   :  { %v394_v15 = vsub.f32 1.0, %v393_v13  ;;  %v336_v16 = vmul.f32 %v1551_v4, %v335_v11 }
 0x386   :  { %v337_v19 = vadd.f32 %v1551_v4, %v336_v16  ;;  %v395_v20 = vmul.f32 %v1553_v8, %v394_v15 }
 0x388   :  { %v341_v23 = vsel %vm340_vm10, %v1551_v4, %v337_v19  ;;  %v396_v24 = vadd.f32 %v1553_v8, %v395_v20 }
 0x389   :  { %v346_v25 = vsel %vm343_vm11, %v345_v22, %v341_v23 }
 0x38a   :  { %v348_v27 = vmul.f32 2.0, %v346_v25  ;;  %v400_v28 = vsel %vm399_vm13, %v1553_v8, %v396_v24  ;;  %v350_v38 = vmul.f32 0.0, %v346_v25 }
 0x38b   :  { %v405_v29 = vsel %vm402_vm14, %v404_v26, %v400_v28 }
 0x38c   :  { %v1475_v30 = vadd.f32 -1.0, %v348_v27  ;;  %v407_v31 = vmul.f32 2.0, %v405_v29  ;;  %v409_v50 = vmul.f32 %v405_v29, %v1866_v37 }
 0x38e   :  { %352 = vrot.lane.b32.xlu0 %v1475_v30, %s1754_s1  ;;  %v1478_v32 = vadd.f32 -1.0, %v407_v31 }
 0x390   :  { %411 = vrot.lane.b32.xlu1 %v1478_v32, %s1754_s1 }
 0x400   :  { %v353_v33 = vpop.permute.xlu0 %352 }
 0x401   :  { %v355_v34 = vmul.f32 %v353_v33, %v346_v25 }
 0x402   :  { %v412_v35 = vpop.permute.xlu1 %411 }
 0x403   :  { %v414_v36 = vmul.f32 %v412_v35, %v405_v29  ;;  %357 = vrot.lane.b32.xlu2 %v355_v34, %s1754_s1 }
 0x405   :  { %416 = vrot.lane.b32.xlu0 %v414_v36, %s1754_s1 }
 0x45d   :  { %v358_v47 = vpop.permute.xlu2 %357 }
 0x45e   :  { %v1934_v48 = vadd.f32 %v358_v47, %v350_v38 }
 0x460   :  { %1554 = vtanh.f32 %v1934_v48 }
 0x466   :  { %v1555_v49 = vpop.eup %1554 }
 0x467   :  { %363 = vrot.lane.b32.xlu1 %v1555_v49, %s1754_s1 }
 0x477   :  { %v417_v51 = vpop.permute.xlu0 %416 }
 0x478   :  { %v1939_v52 = vadd.f32 %v417_v51, %v409_v50 }
 0x47a   :  { %1556 = vtanh.f32 %v1939_v52 }
 0x480   :  { %v1557_v53 = vpop.eup %1556 }
 0x481   :  { %422 = vrot.lane.b32.xlu2 %v1557_v53, %s1754_s1 }
 0x489   :  { %94 = vperm.xlu2 %1537, %v79_v55  }
 0x4d9   :  { %v364_v56 = vpop.permute.xlu1 %363 }
 0x4da   :  { %v366_v57 = vmul.f32 %v364_v56, %v346_v25 }
 0x4db   :  { %v423_v58 = vpop.permute.xlu2 %422 }
 0x4dc   :  { %v425_v59 = vmul.f32 %v423_v58, %v405_v29  ;;  %427 = vrot.lane.b32.xlu0 %v366_v57, %s1755_s2 }
 0x4de   :  { %452 = vrot.lane.b32.xlu1 %v425_v59, %s1755_s2 }
 0x4e3   :  { %v95_v37 = vpop.permute.xlu2 %94 }
 0x4e4   :  { %vm113_vm15 = vcmp.eq.s32.totalorder %v1859_v12, %v95_v37 }
 0x4e5   :  { %v1457_v60 = vsel %vm113_vm15, 1.0, %v1753_v10 }
 0x4e6   :  { %1465 = vmatmul.msk.f32.gmra.mxu0 %vm139_vm0, %v1457_v60 }
 0x54e   :  { %v428_v61 = vpop.permute.xlu0 %427 }
 0x54f   :  { %1479 = vmatmul.msk.f32.vlgmr.msrb.gmra.mxu2 %vm139_vm0, %v428_v61 }
 0x550   :  { %v453_v62 = vpop.permute.xlu1 %452  ;;  %739 = vmatpush.msrb.mxu2 %v1870_v39 }
 0x551   :  { %1480 = vmatmul.msk.f32.vlgmr.msrb.gmra.mxu3 %vm139_vm0, %v453_v62  ;;  %1483 = vmatmul.msk.f32.vlgmr.msra.gmra.mxu1 %vm139_vm0, %v453_v62 }
 0x552   :  { %764 = vmatpush.msrb.mxu3 %v1872_v40  ;;  %823 = vmatpush.msra.mxu1 %v1820_v3 }
 0x553   :  { %740 = vmatpush.msrb.mxu2 %v1874_v41 }
 0x554   :  { %765 = vmatpush.msrb.mxu3 %v1878_v42  ;;  %824 = vmatpush.msra.mxu1 %v1828_v5 }
 0x555   :  { %741 = vmatpush.msrb.mxu2 %v1880_v43 }
 0x556   :  { %766 = vmatpush.msrb.mxu3 %v1882_v44  ;;  %825 = vmatpush.msra.mxu1 %v1837_v7 }
 0x557   :  { %742 = vmatpush.msrb.mxu2 %v1886_v45 }
 0x558   :  { %767 = vmatpush.msrb.mxu3 %v1888_v46  ;;  %826 = vmatpush.msra.mxu1 %v1847_v9 }
 0x563   :  { %v187_v63 = vpop.f32.mrf.mxu0 }
 0x5ce   :  { %v532_v0 = vpop.f32.mrf.mxu1 }
 0x5cf   :  { %v535_v1 = vadd.f32 %v532_v0, %v187_v63 }
 0x5d1   :  { %v1484_v2 = vmul.f32 -1.442695, %v535_v1 }
 0x5d2   :  { %v448_v4 = vpop.f32.mrf.mxu2 }
 0x5d3   :  { %1558 = vpow2.f32 %v1484_v2 }
 0x5d4   :  { %v473_v6 = vpop.f32.mrf.mxu3 }
 0x5d5   :  { %v474_v8 = vadd.f32 %v473_v6, %v448_v4 }
 0x5d7   :  { %v476_v11 = vadd.f32 %v1927_v54, %v474_v8 }
 0x5d9   :  { %v1559_v13 = vpop.eup %1558  ;;  %v1481_v14 = vmul.f32 -1.442695, %v476_v11 }
 0x5da   :  { %v539_v15 = vadd.f32 1.0, %v1559_v13 }
 0x5db   :  { %1560 = vpow2.f32 %v1481_v14 }
 0x5dc   :  { %1562 = vrcp.f32 %v539_v15  ;;  %v551_v21 = vand.u32 2147483648, %v539_v15  ;;  %v549_v23 = vand.u32 2147483647, %v539_v15  ;;  %vm545_vm2 = vweird.f32 %v539_v15 }
 0x5de   :  { %v552_v26 = vor.u32 1.1754944e-38, %v551_v21  ;;  %vm550_vm4 = vcmp.eq.f32.partialorder %v549_v23, 8.507059e+37 }
 0x5e1   :  { %v1561_v16 = vpop.eup %1560 }
 0x5e2   :  { %v1563_v17 = vpop.eup %1562  ;;  %v480_v18 = vadd.f32 1.0, %v1561_v16 }
 0x5e3   :  { %v541_v19 = vmul.f32 %v1563_v17, %v539_v15  ;;  %vm546_vm1 = vweird.f32 %v1563_v17 }
 0x5e4   :  { %1564 = vrcp.f32 %v480_v18  ;;  %vm547_vm3 = vmor %vm545_vm2, %vm546_vm1  ;;  %v492_v32 = vand.u32 2147483648, %v480_v18  ;;  %v490_v35 = vand.u32 2147483647, %v480_v18  ;;  %vm486_vm6 = vweird.f32 %v480_v18 }
 0x5e5   :  { %v542_v20 = vsub.f32 1.0, %v541_v19 }
 0x5e6   :  { %v493_v38 = vor.u32 1.1754944e-38, %v492_v32  ;;  %vm491_vm8 = vcmp.eq.f32.partialorder %v490_v35, 8.507059e+37 }
 0x5e7   :  { %v543_v22 = vmul.f32 %v1563_v17, %v542_v20 }
 0x5e9   :  { %v544_v24 = vadd.f32 %v1563_v17, %v543_v22 }
 0x5ea   :  { %v1565_v25 = vpop.eup %1564 }
 0x5eb   :  { %v482_v27 = vmul.f32 %v1565_v25, %v480_v18  ;;  %v548_v28 = vsel %vm547_vm3, %v1563_v17, %v544_v24  ;;  %vm487_vm5 = vweird.f32 %v1565_v25 }
 0x5ec   :  { %v553_v29 = vsel %vm550_vm4, %v552_v26, %v548_v28  ;;  %vm488_vm7 = vmor %vm486_vm6, %vm487_vm5 }
 0x5ed   :  { %v483_v30 = vsub.f32 1.0, %v482_v27  ;;  %v555_v31 = vmul.f32 2.0, %v553_v29  ;;  %v557_v61 = vmul.f32 %v553_v29, %v1939_v52 }
 0x5ef   :  { %v1485_v33 = vadd.f32 -1.0, %v555_v31  ;;  %v484_v34 = vmul.f32 %v1565_v25, %v483_v30 }
 0x5f1   :  { %559 = vrot.lane.b32.xlu1 %v1485_v33, %s1754_s1  ;;  %v485_v36 = vadd.f32 %v1565_v25, %v484_v34 }
 0x5f3   :  { %v489_v47 = vsel %vm488_vm7, %v1565_v25, %v485_v36 }
 0x5f4   :  { %v494_v49 = vsel %vm491_vm8, %v493_v38, %v489_v47 }
 0x5f5   :  { %v496_v50 = vmul.f32 2.0, %v494_v49  ;;  %v498_v58 = vmul.f32 %v494_v49, %v1934_v48  ;;  %v80_v48 = vld [vmem:[%s2163_s0 + $0x18] sm:$0xff] }
 0x5f7   :  { %v1482_v51 = vadd.f32 -1.0, %v496_v50 }
 0x5f9   :  { %500 = vrot.lane.b32.xlu0 %v1482_v51, %s1754_s1 }
 0x663   :  { %v560_v53 = vpop.permute.xlu1 %559 }
 0x664   :  { %v562_v55 = vmul.f32 %v560_v53, %v553_v29 }
 0x666   :  { %564 = vrot.lane.b32.xlu0 %v562_v55, %s1754_s1 }
 0x66b   :  { %v501_v56 = vpop.permute.xlu0 %500 }
 0x66c   :  { %v503_v57 = vmul.f32 %v501_v56, %v494_v49 }
 0x66e   :  { %505 = vrot.lane.b32.xlu2 %v503_v57, %s1754_s1 }
 0x6c8   :  { %v506_v59 = vpop.permute.xlu2 %505 }
 0x6c9   :  { %v1972_v37 = vadd.f32 %v506_v59, %v498_v58 }
 0x6cb   :  { %1566 = vtanh.f32 %v1972_v37 }
 0x6d1   :  { %v1567_v60 = vpop.eup %1566 }
 0x6d2   :  { %511 = vrot.lane.b32.xlu1 %v1567_v60, %s1754_s1 }
 0x6d8   :  { %v565_v62 = vpop.permute.xlu0 %564 }
 0x6d9   :  { %v1977_v63 = vadd.f32 %v565_v62, %v557_v61 }
 0x6db   :  { %1568 = vtanh.f32 %v1977_v63 }
 0x6e1   :  { %v1569_v0 = vpop.eup %1568 }
 0x6e2   :  { %570 = vrot.lane.b32.xlu2 %v1569_v0, %s1754_s1 }
 0x6ea   :  { %97 = vperm.xlu2 %1537, %v80_v48  }
 0x73c   :  { %v571_v1 = vpop.permute.xlu2 %570 }
 0x73d   :  { %v573_v2 = vmul.f32 %v571_v1, %v553_v29 }
 0x73f   :  { %600 = vrot.lane.b32.xlu1 %v573_v2, %s1755_s2 }
 0x744   :  { %v512_v4 = vpop.permute.xlu1 %511  ;;  %v98_v6 = vpop.permute.xlu2 %97 }
 0x745   :  { %v514_v52 = vmul.f32 %v512_v4, %v494_v49  ;;  %vm114_vm9 = vcmp.eq.s32.totalorder %v1859_v12, %v98_v6 }
 0x746   :  { %v1458_v8 = vsel %vm114_vm9, 1.0, %v1753_v10 }
 0x747   :  { %575 = vrot.lane.b32.xlu0 %v514_v52, %s1755_s2  ;;  %1466 = vmatmul.msk.f32.gmra.mxu0 %vm139_vm0, %v1458_v8 }
 0x7b1   :  { %v601_v11 = vpop.permute.xlu1 %600 }
 0x7b2   :  { %1487 = vmatmul.msk.f32.vlgmr.msra.gmra.mxu3 %vm139_vm0, %v601_v11  ;;  %1490 = vmatmul.msk.f32.vlgmr.msrb.gmra.mxu1 %vm139_vm0, %v601_v11 }
 0x7b3   :  { %912 = vmatpush.msra.mxu3 %v1872_v40  ;;  %971 = vmatpush.msrb.mxu1 %v1820_v3 }
 0x7b5   :  { %913 = vmatpush.msra.mxu3 %v1878_v42  ;;  %972 = vmatpush.msrb.mxu1 %v1828_v5 }
 0x7b7   :  { %914 = vmatpush.msra.mxu3 %v1882_v44  ;;  %973 = vmatpush.msrb.mxu1 %v1837_v7 }
 0x7b9   :  { %v576_v13 = vpop.permute.xlu0 %575  ;;  %915 = vmatpush.msra.mxu3 %v1888_v46  ;;  %974 = vmatpush.msrb.mxu1 %v1847_v9 }
 0x7ba   :  { %1486 = vmatmul.msk.f32.vlgmr.msra.gmra.mxu2 %vm139_vm0, %v576_v13 }
 0x7bb   :  { %887 = vmatpush.msra.mxu2 %v1870_v39 }
 0x7bd   :  { %888 = vmatpush.msra.mxu2 %v1874_v41 }
 0x7bf   :  { %889 = vmatpush.msra.mxu2 %v1880_v43 }
 0x7c1   :  { %890 = vmatpush.msra.mxu2 %v1886_v45 }
 0x7c4   :  { %v190_v14 = vpop.f32.mrf.mxu0 }
 0x82f   :  { %v680_v15 = vpop.f32.mrf.mxu1 }
 0x830   :  { %v683_v16 = vadd.f32 %v680_v15, %v190_v14 }
 0x832   :  { %v1491_v17 = vmul.f32 -1.442695, %v683_v16 }
 0x834   :  { %1570 = vpow2.f32 %v1491_v17 }
 0x835   :  { %v621_v20 = vpop.f32.mrf.mxu3 }
 0x83a   :  { %v1571_v18 = vpop.eup %1570 }
 0x83b   :  { %v687_v19 = vadd.f32 1.0, %v1571_v18 }
 0x83d   :  { %1572 = vrcp.f32 %v687_v19  ;;  %v596_v21 = vpop.f32.mrf.mxu2  ;;  %v699_v28 = vand.u32 2147483648, %v687_v19  ;;  %v697_v30 = vand.u32 2147483647, %v687_v19  ;;  %vm693_vm11 = vweird.f32 %v687_v19 }
 0x83e   :  { %v622_v22 = vadd.f32 %v621_v20, %v596_v21 }
 0x83f   :  { %v700_v34 = vor.u32 1.1754944e-38, %v699_v28  ;;  %vm698_vm13 = vcmp.eq.f32.partialorder %v697_v30, 8.507059e+37 }
 0x840   :  { %v624_v23 = vadd.f32 %v1927_v54, %v622_v22 }
 0x842   :  { %v1488_v24 = vmul.f32 -1.442695, %v624_v23 }
 0x843   :  { %v1573_v25 = vpop.eup %1572 }
 0x844   :  { %v689_v26 = vmul.f32 %v1573_v25, %v687_v19  ;;  %1574 = vpow2.f32 %v1488_v24  ;;  %vm694_vm10 = vweird.f32 %v1573_v25 }
 0x845   :  { %vm695_vm12 = vmor %vm693_vm11, %vm694_vm10 }
 0x846   :  { %v690_v27 = vsub.f32 1.0, %v689_v26 }
 0x848   :  { %v691_v29 = vmul.f32 %v1573_v25, %v690_v27 }
 0x84a   :  { %v1575_v31 = vpop.eup %1574  ;;  %v692_v32 = vadd.f32 %v1573_v25, %v691_v29 }
 0x84b   :  { %v628_v33 = vadd.f32 1.0, %v1575_v31 }
 0x84c   :  { %v696_v35 = vsel %vm695_vm12, %v1573_v25, %v692_v32 }
 0x84d   :  { %1576 = vrcp.f32 %v628_v33  ;;  %v701_v36 = vsel %vm698_vm13, %v700_v34, %v696_v35  ;;  %v640_v53 = vand.u32 2147483648, %v628_v33  ;;  %v638_v56 = vand.u32 2147483647, %v628_v33 }
 0x84e   :  { %v703_v38 = vmul.f32 2.0, %v701_v36  ;;  %vm634_vm15 = vweird.f32 %v628_v33  ;;  %v705_v8 = vmul.f32 %v701_v36, %v1977_v63 }
 0x84f   :  { %v641_v58 = vor.u32 1.1754944e-38, %v640_v53  ;;  %vm639_vm2 = vcmp.eq.f32.partialorder %v638_v56, 8.507059e+37 }
 0x850   :  { %v1492_v47 = vadd.f32 -1.0, %v703_v38 }
 0x852   :  { %707 = vrot.lane.b32.xlu1 %v1492_v47, %s1754_s1 }
 0x853   :  { %v1577_v49 = vpop.eup %1576 }
 0x854   :  { %v630_v50 = vmul.f32 %v1577_v49, %v628_v33  ;;  %vm635_vm14 = vweird.f32 %v1577_v49 }
 0x855   :  { %vm636_vm1 = vmor %vm634_vm15, %vm635_vm14 }
 0x856   :  { %v631_v51 = vsub.f32 1.0, %v630_v50 }
 0x858   :  { %v632_v55 = vmul.f32 %v1577_v49, %v631_v51 }
 0x85a   :  { %v633_v57 = vadd.f32 %v1577_v49, %v632_v55 }
 0x85c   :  { %v637_v59 = vsel %vm636_vm1, %v1577_v49, %v633_v57 }
 0x85d   :  { %v642_v60 = vsel %vm639_vm2, %v641_v58, %v637_v59 }
 0x85e   :  { %v644_v61 = vmul.f32 2.0, %v642_v60  ;;  %v646_v4 = vmul.f32 %v642_v60, %v1972_v37  ;;  %v81_v37 = vld [vmem:[%s2163_s0 + $0x20] sm:$0xff] }
 0x860   :  { %v1489_v62 = vadd.f32 -1.0, %v644_v61 }
 0x862   :  { %648 = vrot.lane.b32.xlu0 %v1489_v62, %s1754_s1 }
 0x8c4   :  { %v708_v0 = vpop.permute.xlu1 %707 }
 0x8c5   :  { %v710_v48 = vmul.f32 %v708_v0, %v701_v36 }
 0x8c7   :  { %712 = vrot.lane.b32.xlu0 %v710_v48, %s1754_s1 }
 0x8d4   :  { %v649_v1 = vpop.permute.xlu0 %648 }
 0x8d5   :  { %v651_v2 = vmul.f32 %v649_v1, %v642_v60 }
 0x8d7   :  { %653 = vrot.lane.b32.xlu2 %v651_v2, %s1754_s1 }
 0x931   :  { %v654_v6 = vpop.permute.xlu2 %653 }
 0x932   :  { %v2010_v52 = vadd.f32 %v654_v6, %v646_v4 }
 0x934   :  { %1578 = vtanh.f32 %v2010_v52 }
 0x939   :  { %v713_v11 = vpop.permute.xlu0 %712 }
 0x93a   :  { %v1579_v13 = vpop.eup %1578  ;;  %v2014_v14 = vadd.f32 %v713_v11, %v705_v8 }
 0x93b   :  { %659 = vrot.lane.b32.xlu1 %v1579_v13, %s1754_s1 }
 0x93c   :  { %1580 = vtanh.f32 %v2014_v14 }
 0x942   :  { %v1581_v15 = vpop.eup %1580 }
 0x943   :  { %718 = vrot.lane.b32.xlu2 %v1581_v15, %s1754_s1 }
 0x94b   :  { %100 = vperm.xlu2 %1537, %v81_v37  }
 0x99d   :  { %v719_v16 = vpop.permute.xlu2 %718 }
 0x99e   :  { %v721_v17 = vmul.f32 %v719_v16, %v701_v36 }
 0x9a0   :  { %748 = vrot.lane.b32.xlu1 %v721_v17, %s1755_s2 }
 0x9a5   :  { %v101_v63 = vpop.permute.xlu2 %100 }
 0x9a6   :  { %vm115_vm3 = vcmp.eq.s32.totalorder %v1859_v12, %v101_v63 }
 0x9a7   :  { %v1459_v18 = vsel %vm115_vm3, 1.0, %v1753_v10 }
 0x9a8   :  { %1467 = vmatmul.msk.f32.gmra.mxu0 %vm139_vm0, %v1459_v18 }
 0x9ad   :  { %v660_v19 = vpop.permute.xlu1 %659 }
 0x9ae   :  { %v662_v20 = vmul.f32 %v660_v19, %v642_v60 }
 0x9b0   :  { %723 = vrot.lane.b32.xlu0 %v662_v20, %s1755_s2 }
 0xa12   :  { %v749_v21 = vpop.permute.xlu1 %748 }
 0xa13   :  { %1494 = vmatmul.msk.f32.vlgmr.msrb.gmra.mxu3 %vm139_vm0, %v749_v21  ;;  %1497 = vmatmul.msk.f32.vlgmr.msra.gmra.mxu1 %vm139_vm0, %v749_v21 }
 0xa14   :  { %1060 = vmatpush.msrb.mxu3 %v1872_v40  ;;  %1119 = vmatpush.msra.mxu1 %v1820_v3 }
 0xa16   :  { %1061 = vmatpush.msrb.mxu3 %v1878_v42  ;;  %1120 = vmatpush.msra.mxu1 %v1828_v5 }
 0xa18   :  { %1062 = vmatpush.msrb.mxu3 %v1882_v44  ;;  %1121 = vmatpush.msra.mxu1 %v1837_v7 }
 0xa1a   :  { %1063 = vmatpush.msrb.mxu3 %v1888_v46  ;;  %1122 = vmatpush.msra.mxu1 %v1847_v9 }
 0xa22   :  { %v724_v22 = vpop.permute.xlu0 %723 }
 0xa23   :  { %1493 = vmatmul.msk.f32.vlgmr.msrb.gmra.mxu2 %vm139_vm0, %v724_v22 }
 0xa24   :  { %1035 = vmatpush.msrb.mxu2 %v1870_v39 }
 0xa25   :  { %v193_v23 = vpop.f32.mrf.mxu0 }
 0xa26   :  { %1036 = vmatpush.msrb.mxu2 %v1874_v41 }
 0xa28   :  { %1037 = vmatpush.msrb.mxu2 %v1880_v43 }
 0xa2a   :  { %1038 = vmatpush.msrb.mxu2 %v1886_v45 }
 0xa90   :  { %v828_v24 = vpop.f32.mrf.mxu1 }
 0xa91   :  { %v831_v25 = vadd.f32 %v828_v24, %v193_v23 }
 0xa93   :  { %v1498_v26 = vmul.f32 -1.442695, %v831_v25 }
 0xa95   :  { %1582 = vpow2.f32 %v1498_v26 }
 0xa96   :  { %v769_v31 = vpop.f32.mrf.mxu3 }
 0xa9b   :  { %v1583_v27 = vpop.eup %1582 }
 0xa9c   :  { %v835_v28 = vadd.f32 1.0, %v1583_v27 }
 0xa9e   :  { %1584 = vrcp.f32 %v835_v28  ;;  %v847_v35 = vand.u32 2147483648, %v835_v28  ;;  %v845_v47 = vand.u32 2147483647, %v835_v28  ;;  %vm841_vm5 = vweird.f32 %v835_v28 }
 0xaa0   :  { %v848_v51 = vor.u32 1.1754944e-38, %v847_v35  ;;  %vm846_vm7 = vcmp.eq.f32.partialorder %v845_v47, 8.507059e+37 }
 0xaa4   :  { %v1585_v29 = vpop.eup %1584 }
 0xaa5   :  { %v837_v30 = vmul.f32 %v1585_v29, %v835_v28  ;;  %vm842_vm4 = vweird.f32 %v1585_v29 }
 0xaa6   :  { %v744_v32 = vpop.f32.mrf.mxu2  ;;  %vm843_vm6 = vmor %vm841_vm5, %vm842_vm4 }
 0xaa7   :  { %v838_v33 = vsub.f32 1.0, %v837_v30  ;;  %v770_v34 = vadd.f32 %v769_v31, %v744_v32 }
 0xaa9   :  { %v772_v36 = vadd.f32 %v1927_v54, %v770_v34  ;;  %v839_v38 = vmul.f32 %v1585_v29, %v838_v33 }
 0xaab   :  { %v1495_v49 = vmul.f32 -1.442695, %v772_v36  ;;  %v840_v50 = vadd.f32 %v1585_v29, %v839_v38 }
 0xaad   :  { %1586 = vpow2.f32 %v1495_v49  ;;  %v844_v53 = vsel %vm843_vm6, %v1585_v29, %v840_v50 }
 0xaae   :  { %v849_v55 = vsel %vm846_vm7, %v848_v51, %v844_v53 }
 0xaaf   :  { %v851_v56 = vmul.f32 2.0, %v849_v55  ;;  %v853_v63 = vmul.f32 %v849_v55, %v2014_v14 }
 0xab1   :  { %v1499_v57 = vadd.f32 -1.0, %v851_v56 }
 0xab3   :  { %v1587_v58 = vpop.eup %1586  ;;  %855 = vrot.lane.b32.xlu1 %v1499_v57, %s1754_s1 }
 0xab4   :  { %v776_v59 = vadd.f32 1.0, %v1587_v58 }
 0xab6   :  { %1588 = vrcp.f32 %v776_v59  ;;  %v788_v0 = vand.u32 2147483648, %v776_v59  ;;  %v786_v1 = vand.u32 2147483647, %v776_v59  ;;  %vm782_vm9 = vweird.f32 %v776_v59 }
 0xab8   :  { %v789_v4 = vor.u32 1.1754944e-38, %v788_v0  ;;  %vm787_vm11 = vcmp.eq.f32.partialorder %v786_v1, 8.507059e+37 }
 0xabc   :  { %v1589_v60 = vpop.eup %1588 }
 0xabd   :  { %v778_v61 = vmul.f32 %v1589_v60, %v776_v59  ;;  %vm783_vm8 = vweird.f32 %v1589_v60 }
 0xabe   :  { %vm784_vm10 = vmor %vm782_vm9, %vm783_vm8 }
 0xabf   :  { %v779_v62 = vsub.f32 1.0, %v778_v61 }
 0xac1   :  { %v780_v48 = vmul.f32 %v1589_v60, %v779_v62 }
 0xac3   :  { %v781_v2 = vadd.f32 %v1589_v60, %v780_v48 }
 0xac5   :  { %v785_v6 = vsel %vm784_vm10, %v1589_v60, %v781_v2 }
 0xac6   :  { %v790_v8 = vsel %vm787_vm11, %v789_v4, %v785_v6 }
 0xac7   :  { %v792_v11 = vmul.f32 2.0, %v790_v8  ;;  %v794_v18 = vmul.f32 %v790_v8, %v2010_v52  ;;  %v82_v52 = vld [vmem:[%s2163_s0 + $0x28] sm:$0xff] }
 0xac9   :  { %v1496_v13 = vadd.f32 -1.0, %v792_v11 }
 0xacb   :  { %796 = vrot.lane.b32.xlu0 %v1496_v13, %s1754_s1 }
 0xb25   :  { %v856_v15 = vpop.permute.xlu1 %855 }
 0xb26   :  { %v858_v37 = vmul.f32 %v856_v15, %v849_v55 }
 0xb28   :  { %860 = vrot.lane.b32.xlu0 %v858_v37, %s1754_s1 }
 0xb3d   :  { %v797_v16 = vpop.permute.xlu0 %796 }
 0xb3e   :  { %v799_v17 = vmul.f32 %v797_v16, %v790_v8 }
 0xb40   :  { %801 = vrot.lane.b32.xlu2 %v799_v17, %s1754_s1 }
 0xb9a   :  { %v861_v19 = vpop.permute.xlu0 %860  ;;  %v802_v20 = vpop.permute.xlu2 %801 }
 0xb9b   :  { %v2049_v21 = vadd.f32 %v861_v19, %v853_v63  ;;  %v2051_v22 = vadd.f32 %v802_v20, %v794_v18  ;;  %v83_v20 = vld [vmem:[%s2163_s0 + $0x30] sm:$0xff] }
 0xb9d   :  { %1590 = vtanh.f32 %v2049_v21 }
 0xb9e   :  { %1592 = vtanh.f32 %v2051_v22 }
 0xba3   :  { %v1591_v23 = vpop.eup %1590 }
 0xba4   :  { %v1593_v24 = vpop.eup %1592  ;;  %866 = vrot.lane.b32.xlu2 %v1591_v23, %s1754_s1 }
 0xba5   :  { %807 = vrot.lane.b32.xlu1 %v1593_v24, %s1754_s1 }
 0xbac   :  { %103 = vperm.xlu2 %1537, %v82_v52  }
 0xbfe   :  { %v867_v14 = vpop.permute.xlu2 %866 }
 0xbff   :  { %v869_v25 = vmul.f32 %v867_v14, %v849_v55 }
 0xc01   :  { %896 = vrot.lane.b32.xlu1 %v869_v25, %s1755_s2 }
 0xc06   :  { %v104_v26 = vpop.permute.xlu2 %103 }
 0xc07   :  { %vm116_vm12 = vcmp.eq.s32.totalorder %v1859_v12, %v104_v26 }
 0xc08   :  { %v1460_v27 = vsel %vm116_vm12, 1.0, %v1753_v10 }
 0xc09   :  { %1468 = vmatmul.msk.f32.gmra.mxu0 %vm139_vm0, %v1460_v27  ;;  %v1636_v27 = vld [vmem:[#allocation2 + $0x18] sm:$0xff] }
 0xc17   :  { %v808_v28 = vpop.permute.xlu1 %807 }
 0xc18   :  { %v810_v29 = vmul.f32 %v808_v28, %v790_v8  ;;  %v1637_v28 = vld [vmem:[#allocation2 + $0x10] sm:$0xff] }
 0xc1a   :  { %871 = vrot.lane.b32.xlu0 %v810_v29, %s1755_s2  ;;  %v1638_v29 = vld [vmem:[#allocation2 + $0x8] sm:$0xff] }
 0xc73   :  { %v897_v30 = vpop.permute.xlu1 %896 }
 0xc74   :  { %1501 = vmatmul.msk.f32.vlgmr.msra.gmra.mxu3 %vm139_vm0, %v897_v30  ;;  %1504 = vmatmul.msk.f32.vlgmr.msrb.gmra.mxu1 %vm139_vm0, %v897_v30  ;;  %v1639_v30 = vld [vmem:[#allocation2] sm:$0xff] }
 0xc75   :  { %1208 = vmatpush.msra.mxu3 %v1872_v40  ;;  %1267 = vmatpush.msrb.mxu1 %v1820_v3 }
 0xc77   :  { %1209 = vmatpush.msra.mxu3 %v1878_v42  ;;  %1268 = vmatpush.msrb.mxu1 %v1828_v5 }
 0xc79   :  { %1210 = vmatpush.msra.mxu3 %v1882_v44  ;;  %1269 = vmatpush.msrb.mxu1 %v1837_v7 }
 0xc7b   :  { %1211 = vmatpush.msra.mxu3 %v1888_v46  ;;  %1270 = vmatpush.msrb.mxu1 %v1847_v9 }
 0xc86   :  { %v196_v3 = vpop.f32.mrf.mxu0 }
 0xc8c   :  { %v872_v31 = vpop.permute.xlu0 %871 }
 0xc8d   :  { %1500 = vmatmul.msk.f32.vlgmr.msra.gmra.mxu2 %vm139_vm0, %v872_v31 }
 0xc8e   :  { %1183 = vmatpush.msra.mxu2 %v1870_v39 }
 0xc90   :  { %1184 = vmatpush.msra.mxu2 %v1874_v41 }
 0xc92   :  { %1185 = vmatpush.msra.mxu2 %v1880_v43 }
 0xc94   :  { %1186 = vmatpush.msra.mxu2 %v1886_v45 }
 0xcf1   :  { %v976_v5 = vpop.f32.mrf.mxu1 }
 0xcf2   :  { %v979_v40 = vadd.f32 %v976_v5, %v196_v3  ;;  %v1640_v3 = vld [vmem:[#allocation5 + $0x18] sm:$0xff]  ;;  %v1641_v5 = vld [vmem:[#allocation5 + $0x10] sm:$0xff] }
 0xcf4   :  { %v1505_v42 = vmul.f32 -1.442695, %v979_v40  ;;  %v1642_v40 = vld [vmem:[#allocation5 + $0x8] sm:$0xff] }
 0xcf6   :  { %1594 = vpow2.f32 %v1505_v42  ;;  %v1643_v42 = vld [vmem:[#allocation5] sm:$0xff] }
 0xcf7   :  { %v917_v36 = vpop.f32.mrf.mxu3 }
 0xcfc   :  { %v1595_v7 = vpop.eup %1594 }
 0xcfd   :  { %v983_v44 = vadd.f32 1.0, %v1595_v7 }
 0xcff   :  { %1596 = vrcp.f32 %v983_v44  ;;  %v995_v33 = vand.u32 2147483648, %v983_v44  ;;  %v993_v39 = vand.u32 2147483647, %v983_v44  ;;  %vm989_vm14 = vweird.f32 %v983_v44 }
 0xd01   :  { %v996_v43 = vor.u32 1.1754944e-38, %v995_v33  ;;  %vm994_vm1 = vcmp.eq.f32.partialorder %v993_v39, 8.507059e+37 }
 0xd05   :  { %v1597_v9 = vpop.eup %1596 }
 0xd06   :  { %v985_v46 = vmul.f32 %v1597_v9, %v983_v44  ;;  %vm990_vm13 = vweird.f32 %v1597_v9 }
 0xd07   :  { %vm991_vm15 = vmor %vm989_vm14, %vm990_vm13 }
 0xd08   :  { %v986_v32 = vsub.f32 1.0, %v985_v46 }
 0xd0a   :  { %v987_v34 = vmul.f32 %v1597_v9, %v986_v32 }
 0xd0c   :  { %v988_v41 = vadd.f32 %v1597_v9, %v987_v34 }
 0xd0e   :  { %v992_v45 = vsel %vm991_vm15, %v1597_v9, %v988_v41 }
 0xd0f   :  { %v997_v35 = vsel %vm994_vm1, %v996_v43, %v992_v45 }
 0xd10   :  { %v892_v38 = vpop.f32.mrf.mxu2  ;;  %v999_v47 = vmul.f32 2.0, %v997_v35  ;;  %v1001_v15 = vmul.f32 %v997_v35, %v2049_v21 }
 0xd11   :  { %v918_v49 = vadd.f32 %v917_v36, %v892_v38 }
 0xd12   :  { %v1506_v50 = vadd.f32 -1.0, %v999_v47 }
 0xd13   :  { %v920_v51 = vadd.f32 %v1927_v54, %v918_v49 }
 0xd14   :  { %1003 = vrot.lane.b32.xlu1 %v1506_v50, %s1754_s1 }
 0xd15   :  { %v1502_v53 = vmul.f32 -1.442695, %v920_v51 }
 0xd17   :  { %1598 = vpow2.f32 %v1502_v53 }
 0xd1d   :  { %v1599_v55 = vpop.eup %1598 }
 0xd1e   :  { %v924_v56 = vadd.f32 1.0, %v1599_v55 }
 0xd20   :  { %1600 = vrcp.f32 %v924_v56  ;;  %v936_v60 = vand.u32 2147483648, %v924_v56  ;;  %v934_v62 = vand.u32 2147483647, %v924_v56  ;;  %vm930_vm3 = vweird.f32 %v924_v56 }
 0xd22   :  { %v937_v48 = vor.u32 1.1754944e-38, %v936_v60  ;;  %vm935_vm5 = vcmp.eq.f32.partialorder %v934_v62, 8.507059e+37 }
 0xd26   :  { %v1601_v57 = vpop.eup %1600 }
 0xd27   :  { %v926_v58 = vmul.f32 %v1601_v57, %v924_v56  ;;  %vm931_vm2 = vweird.f32 %v1601_v57 }
 0xd28   :  { %vm932_vm4 = vmor %vm930_vm3, %vm931_vm2 }
 0xd29   :  { %v927_v59 = vsub.f32 1.0, %v926_v58 }
 0xd2b   :  { %v928_v61 = vmul.f32 %v1601_v57, %v927_v59 }
 0xd2d   :  { %v929_v0 = vadd.f32 %v1601_v57, %v928_v61 }
 0xd2f   :  { %v933_v1 = vsel %vm932_vm4, %v1601_v57, %v929_v0  ;;  %v2110_v57 = vld [vmem:[%s2168_s5] ss:$0 sm:$0xff] }
 0xd30   :  { %v938_v54 = vsel %vm935_vm5, %v937_v48, %v933_v1 }
 0xd31   :  { %v940_v2 = vmul.f32 2.0, %v938_v54  ;;  %v942_v17 = vmul.f32 %v938_v54, %v2051_v22 }
 0xd33   :  { %v1503_v4 = vadd.f32 -1.0, %v940_v2 }
 0xd35   :  { %944 = vrot.lane.b32.xlu0 %v1503_v4, %s1754_s1 }
 0xd86   :  { %v1004_v6 = vpop.permute.xlu1 %1003 }
 0xd87   :  { %v1006_v8 = vmul.f32 %v1004_v6, %v997_v35 }
 0xd89   :  { %1008 = vrot.lane.b32.xlu0 %v1006_v8, %s1754_s1 }
 0xda7   :  { %v945_v11 = vpop.permute.xlu0 %944 }
 0xda8   :  { %v947_v13 = vmul.f32 %v945_v11, %v938_v54 }
 0xdaa   :  { %949 = vrot.lane.b32.xlu2 %v947_v13, %s1754_s1 }
 0xdfb   :  { %v1009_v37 = vpop.permute.xlu0 %1008 }
 0xdfc   :  { %v2086_v16 = vadd.f32 %v1009_v37, %v1001_v15 }
 0xdfe   :  { %1602 = vtanh.f32 %v2086_v16 }
 0xe04   :  { %v1603_v63 = vpop.eup %1602  ;;  %v950_v18 = vpop.permute.xlu2 %949 }
 0xe05   :  { %v2090_v19 = vadd.f32 %v950_v18, %v942_v17  ;;  %1014 = vrot.lane.b32.xlu2 %v1603_v63, %s1754_s1 }
 0xe07   :  { %1604 = vtanh.f32 %v2090_v19 }
 0xe0d   :  { %v1605_v21 = vpop.eup %1604  ;;  %106 = vperm.xlu2 %1537, %v83_v20  }
 0xe0e   :  { %955 = vrot.lane.b32.xlu1 %v1605_v21, %s1754_s1 }
 0xe5f   :  { %v1015_v23 = vpop.permute.xlu2 %1014 }
 0xe60   :  { %v1017_v24 = vmul.f32 %v1015_v23, %v997_v35 }
 0xe62   :  { %1044 = vrot.lane.b32.xlu1 %v1017_v24, %s1755_s2 }
 0xe67   :  { %v107_v22 = vpop.permute.xlu2 %106 }
 0xe68   :  { %vm117_vm6 = vcmp.eq.s32.totalorder %v1859_v12, %v107_v22  ;;  %v84_v22 = vld [vmem:[%s2163_s0 + $0x38] sm:$0xff] }
 0xe69   :  { %v1461_v52 = vsel %vm117_vm6, 1.0, %v1753_v10 }
 0xe6a   :  { %1469 = vmatmul.msk.f32.gmra.mxu0 %vm139_vm0, %v1461_v52 }
 0xe80   :  { %v956_v14 = vpop.permute.xlu1 %955 }
 0xe81   :  { %v958_v25 = vmul.f32 %v956_v14, %v938_v54 }
 0xe83   :  { %1019 = vrot.lane.b32.xlu0 %v958_v25, %s1755_s2 }
 0xed4   :  { %v1045_v26 = vpop.permute.xlu1 %1044 }
 0xed5   :  { %1508 = vmatmul.msk.f32.vlgmr.msrb.gmra.mxu3 %vm139_vm0, %v1045_v26  ;;  %1511 = vmatmul.msk.f32.vlgmr.msra.gmra.mxu1 %vm139_vm0, %v1045_v26 }
 0xed6   :  { %1356 = vmatpush.msrb.mxu3 %v1636_v27 }
 0xed8   :  { %1357 = vmatpush.msrb.mxu3 %v1637_v28 }
 0xeda   :  { %1358 = vmatpush.msrb.mxu3 %v1638_v29 }
 0xedc   :  { %1359 = vmatpush.msrb.mxu3 %v1639_v30 }
 0xee7   :  { %v199_v7 = vpop.f32.mrf.mxu0 }
 0xef5   :  { %v1020_v31 = vpop.permute.xlu0 %1019 }
 0xef6   :  { %1507 = vmatmul.msk.f32.vlgmr.msrb.gmra.mxu2 %vm139_vm0, %v1020_v31 }
 0xef7   :  { %1331 = vmatpush.msrb.mxu2 %v1640_v3 }
 0xef9   :  { %1332 = vmatpush.msrb.mxu2 %v1641_v5 }
 0xefb   :  { %1333 = vmatpush.msrb.mxu2 %v1642_v40 }
 0xefd   :  { %1334 = vmatpush.msrb.mxu2 %v1643_v42 }
 0xf52   :  { %v1124_v44 = vpop.f32.mrf.mxu1 }
 0xf53   :  { %v1127_v9 = vadd.f32 %v1124_v44, %v199_v7 }
 0xf55   :  { %v1512_v46 = vmul.f32 -1.442695, %v1127_v9 }
 0xf57   :  { %1606 = vpow2.f32 %v1512_v46 }
 0xf58   :  { %v1065_v53 = vpop.f32.mrf.mxu3 }
 0xf5d   :  { %v1607_v32 = vpop.eup %1606 }
 0xf5e   :  { %v1131_v33 = vadd.f32 1.0, %v1607_v32 }
 0xf60   :  { %1608 = vrcp.f32 %v1131_v33  ;;  %v1143_v43 = vand.u32 2147483648, %v1131_v33  ;;  %v1141_v35 = vand.u32 2147483647, %v1131_v33  ;;  %vm1137_vm8 = vweird.f32 %v1131_v33 }
 0xf62   :  { %v1144_v38 = vor.u32 1.1754944e-38, %v1143_v43  ;;  %vm1142_vm10 = vcmp.eq.f32.partialorder %v1141_v35, 8.507059e+37 }
 0xf66   :  { %v1609_v34 = vpop.eup %1608 }
 0xf67   :  { %v1133_v39 = vmul.f32 %v1609_v34, %v1131_v33  ;;  %vm1138_vm7 = vweird.f32 %v1609_v34 }
 0xf68   :  { %vm1139_vm9 = vmor %vm1137_vm8, %vm1138_vm7 }
 0xf69   :  { %v1134_v41 = vsub.f32 1.0, %v1133_v39 }
 0xf6b   :  { %v1135_v45 = vmul.f32 %v1609_v34, %v1134_v41 }
 0xf6d   :  { %v1136_v36 = vadd.f32 %v1609_v34, %v1135_v45 }
 0xf6f   :  { %v1140_v47 = vsel %vm1139_vm9, %v1609_v34, %v1136_v36 }
 0xf70   :  { %v1145_v49 = vsel %vm1142_vm10, %v1144_v38, %v1140_v47 }
 0xf71   :  { %v1147_v50 = vmul.f32 2.0, %v1145_v49  ;;  %v1149_v20 = vmul.f32 %v1145_v49, %v2086_v16 }
 0xf73   :  { %v1513_v51 = vadd.f32 -1.0, %v1147_v50 }
 0xf75   :  { %1151 = vrot.lane.b32.xlu1 %v1513_v51, %s1754_s1 }
 0xf79   :  { %v1040_v55 = vpop.f32.mrf.mxu2 }
 0xf7a   :  { %v1066_v56 = vadd.f32 %v1065_v53, %v1040_v55 }
 0xf7c   :  { %v1068_v58 = vadd.f32 %v2110_v57, %v1066_v56 }
 0xf7e   :  { %v1509_v59 = vmul.f32 -1.442695, %v1068_v58 }
 0xf80   :  { %1610 = vpow2.f32 %v1509_v59 }
 0xf86   :  { %v1611_v60 = vpop.eup %1610 }
 0xf87   :  { %v1072_v61 = vadd.f32 1.0, %v1611_v60 }
 0xf89   :  { %1612 = vrcp.f32 %v1072_v61  ;;  %v1084_v1 = vand.u32 2147483648, %v1072_v61  ;;  %v1082_v2 = vand.u32 2147483647, %v1072_v61  ;;  %vm1078_vm12 = vweird.f32 %v1072_v61 }
 0xf8b   :  { %v1085_v6 = vor.u32 1.1754944e-38, %v1084_v1  ;;  %vm1083_vm14 = vcmp.eq.f32.partialorder %v1082_v2, 8.507059e+37 }
 0xf8f   :  { %v1613_v62 = vpop.eup %1612 }
 0xf90   :  { %v1074_v0 = vmul.f32 %v1613_v62, %v1072_v61  ;;  %vm1079_vm11 = vweird.f32 %v1613_v62 }
 0xf91   :  { %vm1080_vm13 = vmor %vm1078_vm12, %vm1079_vm11 }
 0xf92   :  { %v1075_v48 = vsub.f32 1.0, %v1074_v0 }
 0xf94   :  { %v1076_v54 = vmul.f32 %v1613_v62, %v1075_v48 }
 0xf96   :  { %v1077_v4 = vadd.f32 %v1613_v62, %v1076_v54 }
 0xf98   :  { %v1081_v8 = vsel %vm1080_vm13, %v1613_v62, %v1077_v4 }
 0xf99   :  { %v1086_v11 = vsel %vm1083_vm14, %v1085_v6, %v1081_v8 }
 0xf9a   :  { %v1088_v13 = vmul.f32 2.0, %v1086_v11  ;;  %v1090_v52 = vmul.f32 %v1086_v11, %v2090_v19 }
 0xf9c   :  { %v1510_v15 = vadd.f32 -1.0, %v1088_v13 }
 0xf9e   :  { %1092 = vrot.lane.b32.xlu0 %v1510_v15, %s1754_s1 }
 0xfe7   :  { %v1152_v37 = vpop.permute.xlu1 %1151 }
 0xfe8   :  { %v1154_v17 = vmul.f32 %v1152_v37, %v1145_v49 }
 0xfea   :  { %1156 = vrot.lane.b32.xlu0 %v1154_v17, %s1754_s1 }
0x1010   :  { %v1093_v63 = vpop.permute.xlu0 %1092 }
0x1011   :  { %v1095_v18 = vmul.f32 %v1093_v63, %v1086_v11 }
0x1013   :  { %1097 = vrot.lane.b32.xlu2 %v1095_v18, %s1754_s1 }
0x105c   :  { %v1157_v21 = vpop.permute.xlu0 %1156 }
0x105d   :  { %v2117_v23 = vadd.f32 %v1157_v21, %v1149_v20 }
0x105f   :  { %1614 = vtanh.f32 %v2117_v23 }
0x1065   :  { %v1615_v24 = vpop.eup %1614 }
0x1066   :  { %1162 = vrot.lane.b32.xlu2 %v1615_v24, %s1754_s1 }
0x106d   :  { %v1098_v14 = vpop.permute.xlu2 %1097 }
0x106e   :  { %v2125_v25 = vadd.f32 %v1098_v14, %v1090_v52  ;;  %109 = vperm.xlu2 %1537, %v84_v22  }
0x1070   :  { %1616 = vtanh.f32 %v2125_v25 }
0x1076   :  { %v1617_v16 = vpop.eup %1616 }
0x1077   :  { %1103 = vrot.lane.b32.xlu1 %v1617_v16, %s1754_s1 }
0x10c0   :  { %v1163_v26 = vpop.permute.xlu2 %1162 }
0x10c1   :  { %v1165_v27 = vmul.f32 %v1163_v26, %v1145_v49 }
0x10c3   :  { %1192 = vrot.lane.b32.xlu1 %v1165_v27, %s1755_s2 }
0x10c8   :  { %v110_v28 = vpop.permute.xlu2 %109 }
0x10c9   :  { %vm118_vm15 = vcmp.eq.s32.totalorder %v1859_v12, %v110_v28 }
0x10ca   :  { %v1462_v29 = vsel %vm118_vm15, 1.0, %v1753_v10 }
0x10cb   :  { %1470 = vmatmul.msk.f32.gmra.mxu0 %vm139_vm0, %v1462_v29 }
0x10e9   :  { %v1104_v19 = vpop.permute.xlu1 %1103 }
0x10ea   :  { %v1106_v30 = vmul.f32 %v1104_v19, %v1086_v11 }
0x10ec   :  { %1167 = vrot.lane.b32.xlu0 %v1106_v30, %s1755_s2 }
0x1135   :  { %v1193_v31 = vpop.permute.xlu1 %1192 }
0x1136   :  { %1515 = vmatmul.msk.f32.vlgmr.msra.gmra.mxu3 %vm139_vm0, %v1193_v31  ;;  %1518 = vmatmul.msk.f32.vlgmr.msrb.gmra.mxu1 %vm139_vm0, %v1193_v31 }
0x1148   :  { %v202_v5 = vpop.f32.mrf.mxu0 }
0x115e   :  { %v1168_v3 = vpop.permute.xlu0 %1167 }
0x115f   :  { %1514 = vmatmul.msk.f32.vlgmr.msra.gmra.mxu2 %vm139_vm0, %v1168_v3 }
0x11b3   :  { %v1272_v40 = vpop.f32.mrf.mxu1 }
0x11b4   :  { %v1275_v42 = vadd.f32 %v1272_v40, %v202_v5 }
0x11b6   :  { %v1519_v12 = vmul.f32 -1.442695, %v1275_v42 }
0x11b8   :  { %1618 = vpow2.f32 %v1519_v12 }
0x11b9   :  { %v1213_v38 = vpop.f32.mrf.mxu3 }
0x11be   :  { %v1619_v10 = vpop.eup %1618 }
0x11bf   :  { %v1279_v7 = vadd.f32 1.0, %v1619_v10 }
0x11c1   :  { %1620 = vrcp.f32 %v1279_v7  ;;  %v1291_v32 = vand.u32 2147483648, %v1279_v7  ;;  %v1289_v34 = vand.u32 2147483647, %v1279_v7  ;;  %vm1285_vm2 = vweird.f32 %v1279_v7 }
0x11c3   :  { %v1292_v41 = vor.u32 1.1754944e-38, %v1291_v32  ;;  %vm1290_vm4 = vcmp.eq.f32.partialorder %v1289_v34, 8.507059e+37 }
0x11c7   :  { %v1621_v44 = vpop.eup %1620 }
0x11c8   :  { %v1281_v9 = vmul.f32 %v1621_v44, %v1279_v7  ;;  %vm1286_vm1 = vweird.f32 %v1621_v44 }
0x11c9   :  { %vm1287_vm3 = vmor %vm1285_vm2, %vm1286_vm1 }
0x11ca   :  { %v1282_v46 = vsub.f32 1.0, %v1281_v9 }
0x11cc   :  { %v1283_v33 = vmul.f32 %v1621_v44, %v1282_v46 }
0x11ce   :  { %v1284_v39 = vadd.f32 %v1621_v44, %v1283_v33 }
0x11d0   :  { %v1288_v43 = vsel %vm1287_vm3, %v1621_v44, %v1284_v39 }
0x11d1   :  { %v1293_v45 = vsel %vm1290_vm4, %v1292_v41, %v1288_v43 }
0x11d2   :  { %v1295_v35 = vmul.f32 2.0, %v1293_v45  ;;  %v1297_v15 = vmul.f32 %v1293_v45, %v2117_v23 }
0x11d4   :  { %v1520_v36 = vadd.f32 -1.0, %v1295_v35  ;;  %v1406_v35 = vld [vmem:[#allocation7 + $0x18] sm:$0xff] }
0x11d5   :  { %1428 = vmatpush.msrb.mxu0 %v1406_v35 }
0x11d6   :  { %1299 = vrot.lane.b32.xlu1 %v1520_v36, %s1754_s1  ;;  %v1405_v36 = vld [vmem:[#allocation7 + $0x10] sm:$0xff] }
0x11d7   :  { %1429 = vmatpush.msrb.mxu0 %v1405_v36 }
0x11e2   :  { %v1188_v47 = vpop.f32.mrf.mxu2 }
0x11e3   :  { %v1214_v49 = vadd.f32 %v1213_v38, %v1188_v47  ;;  %v1404_v38 = vld [vmem:[#allocation7 + $0x8] sm:$0xff]  ;;  %v1403_v47 = vld [vmem:[#allocation7] sm:$0xff] }
0x11e4   :  { %1430 = vmatpush.msrb.mxu0 %v1404_v38 }
0x11e5   :  { %v1216_v50 = vadd.f32 %v2110_v57, %v1214_v49 }
0x11e6   :  { %1431 = vmatpush.msrb.mxu0 %v1403_v47 }
0x11e7   :  { %v1516_v51 = vmul.f32 -1.442695, %v1216_v50 }
0x11e9   :  { %1622 = vpow2.f32 %v1516_v51 }
0x11ef   :  { %v1623_v53 = vpop.eup %1622 }
0x11f0   :  { %v1220_v55 = vadd.f32 1.0, %v1623_v53  ;;  %v1539_v53 = vld [vmem:[%s2170_s7] ss:$0 sm:$0xff] }
0x11f2   :  { %1624 = vrcp.f32 %v1220_v55  ;;  %v1232_v60 = vand.u32 2147483648, %v1220_v55  ;;  %v1230_v62 = vand.u32 2147483647, %v1220_v55  ;;  %vm1226_vm6 = vweird.f32 %v1220_v55 }
0x11f4   :  { %v1233_v48 = vor.u32 1.1754944e-38, %v1232_v60  ;;  %vm1231_vm8 = vcmp.eq.f32.partialorder %v1230_v62, 8.507059e+37 }
0x11f8   :  { %v1625_v56 = vpop.eup %1624 }
0x11f9   :  { %v1222_v58 = vmul.f32 %v1625_v56, %v1220_v55  ;;  %vm1227_vm5 = vweird.f32 %v1625_v56 }
0x11fa   :  { %vm1228_vm7 = vmor %vm1226_vm6, %vm1227_vm5 }
0x11fb   :  { %v1223_v59 = vsub.f32 1.0, %v1222_v58 }
0x11fd   :  { %v1224_v61 = vmul.f32 %v1625_v56, %v1223_v59 }
0x11ff   :  { %v1225_v0 = vadd.f32 %v1625_v56, %v1224_v61 }
0x1201   :  { %v1229_v1 = vsel %vm1228_vm7, %v1625_v56, %v1225_v0 }
0x1202   :  { %v1234_v54 = vsel %vm1231_vm8, %v1233_v48, %v1229_v1 }
0x1203   :  { %v1236_v2 = vmul.f32 2.0, %v1234_v54  ;;  %v1238_v18 = vmul.f32 %v1234_v54, %v2125_v25 }
0x1205   :  { %v1517_v4 = vadd.f32 -1.0, %v1236_v2 }
0x1207   :  { %1240 = vrot.lane.b32.xlu0 %v1517_v4, %s1754_s1 }
0x1248   :  { %v1300_v6 = vpop.permute.xlu1 %1299 }
0x1249   :  { %v1302_v8 = vmul.f32 %v1300_v6, %v1293_v45 }
0x124b   :  { %1304 = vrot.lane.b32.xlu0 %v1302_v8, %s1754_s1 }
0x1279   :  { %v1241_v11 = vpop.permute.xlu0 %1240 }
0x127a   :  { %v1243_v13 = vmul.f32 %v1241_v11, %v1234_v54 }
0x127c   :  { %1245 = vrot.lane.b32.xlu2 %v1243_v13, %s1754_s1 }
0x12bd   :  { %v1305_v37 = vpop.permute.xlu0 %1304 }
0x12be   :  { %v1307_v17 = vadd.f32 %v1305_v37, %v1297_v15 }
0x12c0   :  { %1626 = vtanh.f32 %v1307_v17 }
0x12c6   :  { %v1627_v63 = vpop.eup %1626 }
0x12c7   :  { %1310 = vrot.lane.b32.xlu2 %v1627_v63, %s1754_s1 }
0x12d6   :  { %v1246_v20 = vpop.permute.xlu2 %1245 }
0x12d7   :  { %v1248_v21 = vadd.f32 %v1246_v20, %v1238_v18 }
0x12d9   :  { %1628 = vtanh.f32 %v1248_v21 }
0x12df   :  { %v1629_v24 = vpop.eup %1628 }
0x12e0   :  { %1251 = vrot.lane.b32.xlu1 %v1629_v24, %s1754_s1 }
0x1321   :  { %v1311_v22 = vpop.permute.xlu2 %1310 }
0x1322   :  { %v1313_v52 = vmul.f32 %v1311_v22, %v1293_v45 }
0x1324   :  { %1340 = vrot.lane.b32.xlu1 %v1313_v52, %s1755_s2 }
0x1352   :  { %v1252_v14 = vpop.permute.xlu1 %1251 }
0x1353   :  { %v1254_v23 = vmul.f32 %v1252_v14, %v1234_v54 }
0x1355   :  { %1315 = vrot.lane.b32.xlu0 %v1254_v23, %s1755_s2 }
0x1396   :  { %v1341_v16 = vpop.permute.xlu1 %1340 }
0x1397   :  { %1522 = vmatmul.msk.f32.vlgmr.msrb.gmra.mxu3 %vm139_vm0, %v1341_v16 }
0x13c7   :  { %v1316_v26 = vpop.permute.xlu0 %1315 }
0x13c8   :  { %1521 = vmatmul.msk.f32.vlgmr.msrb.gmra.mxu2 %vm139_vm0, %v1316_v26 }
0x141a   :  { %v1361_v25 = vpop.f32.mrf.mxu3 }
0x144b   :  { %v1336_v27 = vpop.f32.mrf.mxu2 }
0x144c   :  { %v1362_v28 = vadd.f32 %v1361_v25, %v1336_v27 }
0x144e   :  { %v1364_v29 = vadd.f32 %v2110_v57, %v1362_v28 }
0x1450   :  { %v1523_v19 = vmul.f32 -1.442695, %v1364_v29 }
0x1452   :  { %1630 = vpow2.f32 %v1523_v19 }
0x1458   :  { %v1631_v30 = vpop.eup %1630 }
0x1459   :  { %v1368_v31 = vadd.f32 1.0, %v1631_v30 }
0x145b   :  { %1632 = vrcp.f32 %v1368_v31  ;;  %v1380_v42 = vand.u32 2147483648, %v1368_v31  ;;  %v1378_v10 = vand.u32 2147483647, %v1368_v31  ;;  %vm1374_vm10 = vweird.f32 %v1368_v31 }
0x145d   :  { %v1381_v44 = vor.u32 1.1754944e-38, %v1380_v42  ;;  %vm1379_vm12 = vcmp.eq.f32.partialorder %v1378_v10, 8.507059e+37 }
0x1461   :  { %v1633_v3 = vpop.eup %1632 }
0x1462   :  { %v1370_v5 = vmul.f32 %v1633_v3, %v1368_v31  ;;  %vm1375_vm9 = vweird.f32 %v1633_v3 }
0x1463   :  { %vm1376_vm11 = vmor %vm1374_vm10, %vm1375_vm9 }
0x1464   :  { %v1371_v40 = vsub.f32 1.0, %v1370_v5 }
0x1466   :  { %v1372_v12 = vmul.f32 %v1633_v3, %v1371_v40 }
0x1468   :  { %v1373_v7 = vadd.f32 %v1633_v3, %v1372_v12 }
0x146a   :  { %v1377_v9 = vsel %vm1376_vm11, %v1633_v3, %v1373_v7 }
0x146b   :  { %v1382_v46 = vsel %vm1379_vm12, %v1381_v44, %v1377_v9 }
0x146c   :  { %v1384_v57 = vmul.f32 2.0, %v1382_v46  ;;  %v1386_v39 = vmul.f32 %v1382_v46, %v1248_v21 }
0x146e   :  { %v1524_v32 = vadd.f32 -1.0, %v1384_v57 }
0x1470   :  { %1388 = vrot.lane.b32.xlu2 %v1524_v32, %s1754_s1 }
0x14ca   :  { %v1389_v33 = vpop.permute.xlu2 %1388 }
0x14cb   :  { %v1391_v34 = vmul.f32 %v1389_v33, %v1382_v46 }
0x14cd   :  { %1393 = vrot.lane.b32.xlu0 %v1391_v34, %s1754_s1 }
0x153f   :  { %v1394_v41 = vpop.permute.xlu0 %1393 }
0x1540   :  { %v1396_v43 = vadd.f32 %v1394_v41, %v1386_v39 }
0x1542   :  { %1634 = vtanh.f32 %v1396_v43 }
0x1548   :  { %v1635_v45 = vpop.eup %1634 }
0x1549   :  { %1399 = vrot.lane.b32.xlu1 %v1635_v45, %s1754_s1 }
0x15bb   :  { %v1400_v49 = vpop.permute.xlu1 %1399 }
0x15bc   :  { %v1402_v50 = vmul.f32 %v1400_v49, %v1382_v46 }
0x15be   :  { %1412 = vrot.lane.b32.xlu2 %v1402_v50, %s1755_s2 }
0x1618   :  { %v1413_v51 = vpop.permute.xlu2 %1412 }
0x1619   :  { %1525 = vmatmul.msk.f32.vlgmr.msrb.gmra.mxu0 %vm139_vm0, %v1413_v51 }
0x1696   :  { %v1433_v55 = vpop.f32.mrf.mxu0 }
0x1697   :  { %v1434_v56 = vadd.f32 %v1539_v53, %v1433_v55 }
0x1699   :  { %1436 = vst.msk [vmem:[#allocation8] sm:$0xff] %vm139_vm0, %v1434_v56 }
0x169a   :  { %1447 = dma.vmem_to_hbm [thread:$0]  %s1443_s9, 128, %s1445_s12, [#allocation4]  }
0x169b   :  { %1745 = dma.done.wait [#allocation4], 128  }
0x169c   :  { %1746 = vsyncadd [#allocation4], 4294967168 }
0x169d   :  { %1452 = vsyncpa [#allocation3], 1 }
0x169e   :  { %1453 = vsyncpa [#allocation6], 1 }
0x169f   :  { %1454 = vsyncpa [#allocation4], 1 }

</bundles_post_ra>
